<compile_context>
chip_gen: v7x
topology: tpu7x:2x2x1
jax: 0.10.0
libtpu: 0.0.40
codegen_flags: <defaults>
</compile_context>

<pallas_src>
import functools

import jax
import jax.numpy as jnp
import numpy as np
from jax.experimental import pallas as pl
from jax.experimental.pallas import tpu as pltpu

GROUPS = 32
EPS = 1e-5


def _silu(x):
    return x * jax.nn.sigmoid(x)


def _group_norm(x2d, assign, assign_t, gamma, beta):
    """GroupNorm over a (H*W, C) f32 tile; per-group stats via tiny one-hot matmuls.

    `assign` (C, G) / `assign_t` (G, C) are host-precomputed constants.
    sum and sum-of-squares are stacked into one (2, C) operand so the group
    reduction and the broadcast-back are a single MXU matmul each.
    """
    hw, c = x2d.shape
    g = assign.shape[1]
    inv_n = 1.0 / float(hw * (c // g))
    stats_c = jnp.concatenate(
        [jnp.sum(x2d, axis=0, keepdims=True),
         jnp.sum(x2d * x2d, axis=0, keepdims=True)], axis=0)                  # (2, C)
    stats_g = jnp.dot(stats_c, assign, preferred_element_type=jnp.float32) * inv_n
    mean_g = stats_g[0:1]                                                     # (1, G)
    rstd_g = jax.lax.rsqrt(stats_g[1:2] - mean_g * mean_g + EPS)              # (1, G)
    back = jnp.dot(jnp.concatenate([mean_g, rstd_g], axis=0), assign_t,
                   preferred_element_type=jnp.float32)                        # (2, C)
    mean_c, rstd_c = back[0:1], back[1:2]
    scale = gamma * rstd_c
    shift = beta - mean_c * scale
    return x2d * scale + shift


def _shift_rows(x, s):
    """y[p, :] = x[p + s, :] where p + s is in range, else 0 (static shift s)."""
    if s == 0:
        return x
    hw = x.shape[0]
    pad = jnp.zeros((abs(s),) + x.shape[1:], x.dtype)
    if s > 0:
        return jnp.concatenate([x[s:], pad], axis=0)
    return jnp.concatenate([pad, x[: hw + s]], axis=0)


def _conv3x3(h_bf, w_ref, bias, v_left, v_right, W):
    """'Same' 3x3 conv on a flat (H*W, Cin) bf16 activation.

    kw taps are folded into K: one (H*W, 3*Cin) bf16 operand per kh, matmulled
    against (3*Cin, Cout) bf16 weights with f32 accumulation (3 MXU matmuls).
    Row-boundary correctness for the +/-1 in-row shifts comes from the host
    precomputed `v_left` / `v_right` masks; the +/-W (kh) shifts are zero-filled
    so no extra mask is needed.
    """
    hw = h_bf.shape[0]
    cout = w_ref.shape[2]
    zero = jnp.zeros((), h_bf.dtype)
    s_m1 = jnp.where(v_left, _shift_rows(h_bf, -1), zero)   # pixel (h', w-1) -> kw=0
    s_p1 = jnp.where(v_right, _shift_rows(h_bf, +1), zero)  # pixel (h', w+1) -> kw=2
    cat = jnp.concatenate([s_m1, h_bf, s_p1], axis=1)       # (H*W, 3*Cin) bf16
    acc = jnp.zeros((hw, cout), jnp.float32)
    for kh, row_shift in enumerate((-W, 0, +W)):            # h' = h-1, h, h+1
        op = _shift_rows(cat, row_shift)                    # zero-fill handles h edges
        acc = acc + jnp.dot(op, w_ref[kh], preferred_element_type=jnp.float32)
    return acc + bias


def _vae_resblock_kernel(x_ref, mask_ref, a1_ref, a1t_ref, g1_ref, be1_ref,
                         w1_ref, b1_ref, a2_ref, a2t_ref, g2_ref, be2_ref,
                         w2_ref, b2_ref, *rest, W, has_proj):
    if has_proj:
        wr_ref, br_ref, o_ref = rest
    else:
        (o_ref,) = rest

    x = x_ref[0]                                            # (H*W, Cin) f32
    m = mask_ref[...]                                       # (H*W, 2) f32 validity flags
    v_left = m[:, 0:1] > 0.5                                # w > 0
    v_right = m[:, 1:2] > 0.5                               # w < W-1

    h = _silu(_group_norm(x, a1_ref[...], a1t_ref[...],
                          g1_ref[...], be1_ref[...])).astype(jnp.bfloat16)
    h = _conv3x3(h, w1_ref, b1_ref[...], v_left, v_right, W)      # f32 accum
    h = _silu(_group_norm(h, a2_ref[...], a2t_ref[...],
                          g2_ref[...], be2_ref[...])).astype(jnp.bfloat16)
    h = _conv3x3(h, w2_ref, b2_ref[...], v_left, v_right, W)      # f32 accum

    if has_proj:                                            # learned 1x1 projection
        res = jnp.dot(x.astype(jnp.bfloat16), wr_ref[...],
                      preferred_element_type=jnp.float32) + br_ref[...]
    else:                                                   # nn.Identity(): no matmul
        res = x
    o_ref[0] = (h + res).astype(o_ref.dtype)


def vae_residual_block(x_nchw, params):
    N, cin, H, W = x_nchw.shape
    cout = params["conv1_w"].shape[0]
    assert cin % GROUPS == 0 and cout % GROUPS == 0
    has_proj = cin != cout
    HW = H * W

    # glue: NCHW -> (N, H*W, C)  (channels on lanes, flattened spatial on sublanes)
    x2d = jnp.transpose(x_nchw, (0, 2, 3, 1)).reshape(N, HW, cin).astype(jnp.float32)

    # ---- host-precomputed constants (hoisted out of the kernel) ----
    def one_hot_assign(c):
        cg = c // GROUPS
        return jnp.asarray(np.arange(c)[:, None] // cg == np.arange(GROUPS)[None, :],
                           dtype=jnp.float32)                       # (C, G)

    a1 = one_hot_assign(cin)
    a2 = one_hot_assign(cout)

    hh, ww = np.meshgrid(np.arange(H), np.arange(W), indexing="ij")
    ww = ww.reshape(-1)                                              # p = h*W + w
    masks = jnp.asarray(np.stack([ww > 0, ww < W - 1], axis=1), dtype=jnp.float32)

    g1 = params["gn1_w"].reshape(1, cin).astype(jnp.float32)
    be1 = params["gn1_b"].reshape(1, cin).astype(jnp.float32)
    g2 = params["gn2_w"].reshape(1, cout).astype(jnp.float32)
    be2 = params["gn2_b"].reshape(1, cout).astype(jnp.float32)
    # PyTorch (Cout, Cin, 3, 3) -> (kh, kw, Cin, Cout) -> (3, 3*Cin, Cout): kw folded
    # into K, matching the [w-1 | w | w+1] operand concatenation.  Weights in bf16.
    w1 = jnp.transpose(params["conv1_w"], (2, 3, 1, 0)).reshape(3, 3 * cin, cout)
    w2 = jnp.transpose(params["conv2_w"], (2, 3, 1, 0)).reshape(3, 3 * cout, cout)
    w1 = w1.astype(jnp.bfloat16)
    w2 = w2.astype(jnp.bfloat16)
    b1 = params["conv1_b"].reshape(1, cout).astype(jnp.float32)
    b2 = params["conv2_b"].reshape(1, cout).astype(jnp.float32)

    inputs = [x2d, masks, a1, jnp.transpose(a1), g1, be1, w1, b1,
              a2, jnp.transpose(a2), g2, be2, w2, b2]
    if has_proj:
        inputs.append(jnp.transpose(params["res_w"][:, :, 0, 0]).astype(jnp.bfloat16))
        inputs.append(params["res_b"].reshape(1, cout).astype(jnp.float32))

    def full_spec(arr):
        nd = arr.ndim
        return pl.BlockSpec(arr.shape, lambda n, _nd=nd: (0,) * _nd)

    in_specs = ([pl.BlockSpec((1, HW, cin), lambda n: (n, 0, 0))]
                + [full_spec(a) for a in inputs[1:]])

    # Explicit scoped-VMEM budget: double-buffered tiles + weights + shifted/concat
    # bf16 temporaries, with 2x headroom (clamped for v7x's 64 MiB physical VMEM).
    est = (2 * HW * (cin + cout) * 4
           + 2 * (9 * cin * cout + 9 * cout * cout + cin * cout) * 2
           + 12 * HW * 3 * max(cin, cout) * 2)
    vmem_limit = int(min(max(2 * est, 32 * 2 ** 20), 56 * 2 ** 20))

    kernel = functools.partial(_vae_resblock_kernel, W=W, has_proj=has_proj)
    out2d = pl.pallas_call(
        kernel,
        grid=(N,),
        in_specs=in_specs,
        out_specs=pl.BlockSpec((1, HW, cout), lambda n: (n, 0, 0)),
        out_shape=jax.ShapeDtypeStruct((N, HW, cout), jnp.float32),
        compiler_params=pltpu.CompilerParams(
            dimension_semantics=("parallel",),
            vmem_limit_bytes=vmem_limit),
    )(*inputs)

    return jnp.transpose(out2d.reshape(N, H, W, cout), (0, 3, 1, 2))


def _reference(x, params):
    """Pure-JAX f32 reference matching PyTorch semantics (NCHW)."""
    def gn(x, w, b):
        N, C, H, W = x.shape
        xg = x.reshape(N, GROUPS, C // GROUPS, H, W)
        mean = xg.mean(axis=(2, 3, 4), keepdims=True)
        var = xg.var(axis=(2, 3, 4), keepdims=True)
        xn = ((xg - mean) / jnp.sqrt(var + EPS)).reshape(N, C, H, W)
        return xn * w[None, :, None, None] + b[None, :, None, None]

    def conv(x, w, b, pad):
        y = jax.lax.conv_general_dilated(
            x, w, window_strides=(1, 1), padding=[(pad, pad), (pad, pad)],
            dimension_numbers=("NCHW", "OIHW", "NCHW"))
        return y + b[None, :, None, None]

    cout, cin = params["conv1_w"].shape[0], params["conv1_w"].shape[1]
    h = jax.nn.silu(gn(x, params["gn1_w"], params["gn1_b"]))
    h = conv(h, params["conv1_w"], params["conv1_b"], 1)
    h = jax.nn.silu(gn(h, params["gn2_w"], params["gn2_b"]))
    h = conv(h, params["conv2_w"], params["conv2_b"], 1)
    res = x if cin == cout else conv(x, params["res_w"], params["res_b"], 0)
    return h + res


if __name__ == "__main__":
    def make_params(key, cin, cout):
        ks = jax.random.split(key, 10)
        # conv weights are made bf16-representable so the f32 reference isolates
        # the (intended) bf16 activation-operand rounding of the kernel's MXU path.
        bf = lambda a: a.astype(jnp.bfloat16).astype(jnp.float32)
        p = {
            "gn1_w": 1.0 + 0.1 * jax.random.normal(ks[0], (cin,), jnp.float32),
            "gn1_b": 0.1 * jax.random.normal(ks[1], (cin,), jnp.float32),
            "conv1_w": bf(0.05 * jax.random.normal(ks[2], (cout, cin, 3, 3), jnp.float32)),
            "conv1_b": 0.05 * jax.random.normal(ks[3], (cout,), jnp.float32),
            "gn2_w": 1.0 + 0.1 * jax.random.normal(ks[4], (cout,), jnp.float32),
            "gn2_b": 0.1 * jax.random.normal(ks[5], (cout,), jnp.float32),
            "conv2_w": bf(0.05 * jax.random.normal(ks[6], (cout, cout, 3, 3), jnp.float32)),
            "conv2_b": 0.05 * jax.random.normal(ks[7], (cout,), jnp.float32),
        }
        if cin != cout:
            p["res_w"] = bf(0.05 * jax.random.normal(ks[8], (cout, cin, 1, 1), jnp.float32))
            p["res_b"] = 0.05 * jax.random.normal(ks[9], (cout,), jnp.float32)
        return p

    key = jax.random.PRNGKey(0)
    for cin, cout in ((64, 128), (64, 64)):   # learned-projection and identity residual
        kp, kx, key = jax.random.split(key, 3)
        params = make_params(kp, cin, cout)
        x = jax.random.normal(kx, (2, cin, 8, 8), jnp.float32)

        out = jax.block_until_ready(vae_residual_block(x, params))
        assert out.shape == (2, cout, 8, 8), out.shape

        ref = jax.block_until_ready(_reference(x, params))
        out_np, ref_np = np.asarray(out), np.asarray(ref)
        # Conv matmul operands run in bf16 on the MXU (f32 accumulation), so allow a
        # small elementwise tolerance plus a tight aggregate relative-RMS check.
        np.testing.assert_allclose(out_np, ref_np, rtol=5e-2, atol=1e-1)
        rel_rms = (np.sqrt(np.mean((out_np - ref_np) ** 2))
                   / (np.sqrt(np.mean(ref_np ** 2)) + 1e-8))
        assert rel_rms < 2.5e-2, rel_rms

    print("KERNEL_OK")
</pallas_src>

<mosaic_0001>
module attributes {stable_mosaic.version = 11 : i64} {
  func.func @_vae_resblock_kernel(%arg0: i32, %arg1: memref<1x64x64xf32, #tpu.memory_space<vmem>>, %arg2: memref<64x2xf32, #tpu.memory_space<vmem>>, %arg3: memref<64x32xf32, #tpu.memory_space<vmem>>, %arg4: memref<32x64xf32, #tpu.memory_space<vmem>>, %arg5: memref<1x64xf32, #tpu.memory_space<vmem>>, %arg6: memref<1x64xf32, #tpu.memory_space<vmem>>, %arg7: memref<3x192x128xbf16, #tpu.memory_space<vmem>>, %arg8: memref<1x128xf32, #tpu.memory_space<vmem>>, %arg9: memref<128x32xf32, #tpu.memory_space<vmem>>, %arg10: memref<32x128xf32, #tpu.memory_space<vmem>>, %arg11: memref<1x128xf32, #tpu.memory_space<vmem>>, %arg12: memref<1x128xf32, #tpu.memory_space<vmem>>, %arg13: memref<3x384x128xbf16, #tpu.memory_space<vmem>>, %arg14: memref<1x128xf32, #tpu.memory_space<vmem>>, %arg15: memref<64x128xbf16, #tpu.memory_space<vmem>>, %arg16: memref<1x128xf32, #tpu.memory_space<vmem>>, %arg17: memref<1x64x128xf32, #tpu.memory_space<vmem>>) attributes {dimension_semantics = [#tpu.dimension_semantics<parallel>], iteration_bounds = array<i64: 2>, scalar_prefetch = 0 : i64, scratch_operands = 0 : i64, tpu.core_type = #tpu.core_type<tc>, window_params = [{transform_indices = @transform_0, window_bounds = array<i64: 1, 64, 64>}, {pipeline_mode = #tpu.pipeline_mode<synchronous>, transform_indices = @transform_1, window_bounds = array<i64: 64, 2>}, {pipeline_mode = #tpu.pipeline_mode<synchronous>, transform_indices = @transform_2, window_bounds = array<i64: 64, 32>}, {pipeline_mode = #tpu.pipeline_mode<synchronous>, transform_indices = @transform_3, window_bounds = array<i64: 32, 64>}, {pipeline_mode = #tpu.pipeline_mode<synchronous>, transform_indices = @transform_4, window_bounds = array<i64: 1, 64>}, {pipeline_mode = #tpu.pipeline_mode<synchronous>, transform_indices = @transform_5, window_bounds = array<i64: 1, 64>}, {pipeline_mode = #tpu.pipeline_mode<synchronous>, transform_indices = @transform_6, window_bounds = array<i64: 3, 192, 128>}, {pipeline_mode = #tpu.pipeline_mode<synchronous>, transform_indices = @transform_7, window_bounds = array<i64: 1, 128>}, {pipeline_mode = #tpu.pipeline_mode<synchronous>, transform_indices = @transform_8, window_bounds = array<i64: 128, 32>}, {pipeline_mode = #tpu.pipeline_mode<synchronous>, transform_indices = @transform_9, window_bounds = array<i64: 32, 128>}, {pipeline_mode = #tpu.pipeline_mode<synchronous>, transform_indices = @transform_10, window_bounds = array<i64: 1, 128>}, {pipeline_mode = #tpu.pipeline_mode<synchronous>, transform_indices = @transform_11, window_bounds = array<i64: 1, 128>}, {pipeline_mode = #tpu.pipeline_mode<synchronous>, transform_indices = @transform_12, window_bounds = array<i64: 3, 384, 128>}, {pipeline_mode = #tpu.pipeline_mode<synchronous>, transform_indices = @transform_13, window_bounds = array<i64: 1, 128>}, {pipeline_mode = #tpu.pipeline_mode<synchronous>, transform_indices = @transform_14, window_bounds = array<i64: 64, 128>}, {pipeline_mode = #tpu.pipeline_mode<synchronous>, transform_indices = @transform_15, window_bounds = array<i64: 1, 128>}, {transform_indices = @transform_16, window_bounds = array<i64: 1, 64, 128>}]} {
    %c0 = arith.constant 0 : index
    %c0_0 = arith.constant 0 : index
    %c0_1 = arith.constant 0 : index
    %0 = vector.load %arg1[%c0, %c0_0, %c0_1] : memref<1x64x64xf32, #tpu.memory_space<vmem>>, vector<1x64x64xf32>
    %1 = vector.shape_cast %0 : vector<1x64x64xf32> to vector<64x64xf32>
    %c0_2 = arith.constant 0 : index
    %c0_3 = arith.constant 0 : index
    %2 = vector.load %arg2[%c0_2, %c0_3] : memref<64x2xf32, #tpu.memory_space<vmem>>, vector<64x2xf32>
    %3 = vector.extract_strided_slice %2 {offsets = [0, 0], sizes = [64, 1], strides = [1, 1]} : vector<64x2xf32> to vector<64x1xf32>
    %cst = arith.constant 5.000000e-01 : f32
    %4 = vector.broadcast %cst : f32 to vector<64x1xf32>
    %5 = arith.cmpf ogt, %3, %4 : vector<64x1xf32>
    %6 = vector.extract_strided_slice %2 {offsets = [0, 1], sizes = [64, 1], strides = [1, 1]} : vector<64x2xf32> to vector<64x1xf32>
    %cst_4 = arith.constant 5.000000e-01 : f32
    %7 = vector.broadcast %cst_4 : f32 to vector<64x1xf32>
    %8 = arith.cmpf ogt, %6, %7 : vector<64x1xf32>
    %c0_5 = arith.constant 0 : index
    %c0_6 = arith.constant 0 : index
    %9 = vector.load %arg3[%c0_5, %c0_6] : memref<64x32xf32, #tpu.memory_space<vmem>>, vector<64x32xf32>
    %c0_7 = arith.constant 0 : index
    %c0_8 = arith.constant 0 : index
    %10 = vector.load %arg4[%c0_7, %c0_8] : memref<32x64xf32, #tpu.memory_space<vmem>>, vector<32x64xf32>
    %c0_9 = arith.constant 0 : index
    %c0_10 = arith.constant 0 : index
    %11 = vector.load %arg5[%c0_9, %c0_10] : memref<1x64xf32, #tpu.memory_space<vmem>>, vector<1x64xf32>
    %c0_11 = arith.constant 0 : index
    %c0_12 = arith.constant 0 : index
    %12 = vector.load %arg6[%c0_11, %c0_12] : memref<1x64xf32, #tpu.memory_space<vmem>>, vector<1x64xf32>
    %cst_13 = arith.constant dense<0.000000e+00> : vector<64xf32>
    %13 = vector.multi_reduction <add>, %1, %cst_13 [0] : vector<64x64xf32> to vector<64xf32>
    %14 = vector.shape_cast %13 : vector<64xf32> to vector<1x64xf32>
    %15 = arith.mulf %1, %1 : vector<64x64xf32>
    %cst_14 = arith.constant dense<0.000000e+00> : vector<64xf32>
    %16 = vector.multi_reduction <add>, %15, %cst_14 [0] : vector<64x64xf32> to vector<64xf32>
    %17 = vector.shape_cast %16 : vector<64xf32> to vector<1x64xf32>
    %18 = tpu.concatenate %14, %17 in 0 : vector<1x64xf32>, vector<1x64xf32> -> vector<2x64xf32>
    %cst_15 = arith.constant dense<0.000000e+00> : vector<2x32xf32>
    %19 = tpu.matmul %18, %9, %cst_15 {dimension_numbers = #tpu.dot_dimension_numbers<[1], [0], [0], [1], [0, 0, 1, 1], [], []>} : vector<2x64xf32>, vector<64x32xf32>, vector<2x32xf32> -> vector<2x32xf32>
    %cst_16 = arith.constant 7.812500e-03 : f32
    %20 = vector.broadcast %cst_16 : f32 to vector<2x32xf32>
    %21 = arith.mulf %19, %20 : vector<2x32xf32>
    %22 = vector.extract_strided_slice %21 {offsets = [0, 0], sizes = [1, 32], strides = [1, 1]} : vector<2x32xf32> to vector<1x32xf32>
    %23 = vector.extract_strided_slice %21 {offsets = [1, 0], sizes = [1, 32], strides = [1, 1]} : vector<2x32xf32> to vector<1x32xf32>
    %24 = arith.mulf %22, %22 : vector<1x32xf32>
    %25 = arith.subf %23, %24 : vector<1x32xf32>
    %cst_17 = arith.constant 9.99999974E-6 : f32
    %26 = vector.broadcast %cst_17 : f32 to vector<1x32xf32>
    %27 = arith.addf %25, %26 : vector<1x32xf32>
    %28 = math.rsqrt %27 : vector<1x32xf32>
    %29 = tpu.concatenate %22, %28 in 0 : vector<1x32xf32>, vector<1x32xf32> -> vector<2x32xf32>
    %cst_18 = arith.constant dense<0.000000e+00> : vector<2x64xf32>
    %30 = tpu.matmul %29, %10, %cst_18 {dimension_numbers = #tpu.dot_dimension_numbers<[1], [0], [0], [1], [0, 0, 1, 1], [], []>} : vector<2x32xf32>, vector<32x64xf32>, vector<2x64xf32> -> vector<2x64xf32>
    %31 = vector.extract_strided_slice %30 {offsets = [0, 0], sizes = [1, 64], strides = [1, 1]} : vector<2x64xf32> to vector<1x64xf32>
    %32 = vector.extract_strided_slice %30 {offsets = [1, 0], sizes = [1, 64], strides = [1, 1]} : vector<2x64xf32> to vector<1x64xf32>
    %33 = arith.mulf %11, %32 : vector<1x64xf32>
    %34 = arith.mulf %31, %33 : vector<1x64xf32>
    %35 = arith.subf %12, %34 : vector<1x64xf32>
    %36 = vector.broadcast %33 : vector<1x64xf32> to vector<64x64xf32>
    %37 = arith.mulf %1, %36 : vector<64x64xf32>
    %38 = vector.broadcast %35 : vector<1x64xf32> to vector<64x64xf32>
    %39 = arith.addf %37, %38 : vector<64x64xf32>
    %40 = arith.negf %39 : vector<64x64xf32>
    %41 = math.exp %40 : vector<64x64xf32>
    %cst_19 = arith.constant 1.000000e+00 : f32
    %42 = vector.broadcast %cst_19 : f32 to vector<64x64xf32>
    %43 = arith.addf %42, %41 : vector<64x64xf32>
    %44 = arith.divf %42, %43 : vector<64x64xf32>
    %45 = arith.mulf %39, %44 : vector<64x64xf32>
    %46 = arith.truncf %45 : vector<64x64xf32> to vector<64x64xbf16>
    %c0_20 = arith.constant 0 : index
    %c0_21 = arith.constant 0 : index
    %47 = vector.load %arg8[%c0_20, %c0_21] : memref<1x128xf32, #tpu.memory_space<vmem>>, vector<1x128xf32>
    %cst_22 = arith.constant 0.000000e+00 : bf16
    %48 = vector.broadcast %cst_22 : bf16 to vector<1x64xbf16>
    %49 = vector.extract_strided_slice %46 {offsets = [0, 0], sizes = [63, 64], strides = [1, 1]} : vector<64x64xbf16> to vector<63x64xbf16>
    %50 = tpu.concatenate %48, %49 in 0 : vector<1x64xbf16>, vector<63x64xbf16> -> vector<64x64xbf16>
    %cst_23 = arith.constant 0.000000e+00 : bf16
    %51 = vector.shape_cast %5 : vector<64x1xi1> to vector<64x1xi1>
    %52 = vector.broadcast %51 : vector<64x1xi1> to vector<64x64xi1>
    %53 = vector.broadcast %cst_23 : bf16 to vector<64x64xbf16>
    %54 = arith.select %52, %50, %53 : vector<64x64xi1>, vector<64x64xbf16>
    %cst_24 = arith.constant 0.000000e+00 : bf16
    %55 = vector.broadcast %cst_24 : bf16 to vector<1x64xbf16>
    %56 = vector.extract_strided_slice %46 {offsets = [1, 0], sizes = [63, 64], strides = [1, 1]} : vector<64x64xbf16> to vector<63x64xbf16>
    %57 = tpu.concatenate %56, %55 in 0 : vector<63x64xbf16>, vector<1x64xbf16> -> vector<64x64xbf16>
    %cst_25 = arith.constant 0.000000e+00 : bf16
    %58 = vector.shape_cast %8 : vector<64x1xi1> to vector<64x1xi1>
    %59 = vector.broadcast %58 : vector<64x1xi1> to vector<64x64xi1>
    %60 = vector.broadcast %cst_25 : bf16 to vector<64x64xbf16>
    %61 = arith.select %59, %57, %60 : vector<64x64xi1>, vector<64x64xbf16>
    %62 = tpu.concatenate %54, %46, %61 in 1 : vector<64x64xbf16>, vector<64x64xbf16>, vector<64x64xbf16> -> vector<64x192xbf16>
    %cst_26 = arith.constant 0.000000e+00 : f32
    %63 = vector.broadcast %cst_26 : f32 to vector<64x128xf32>
    %cst_27 = arith.constant 0.000000e+00 : bf16
    %64 = vector.broadcast %cst_27 : bf16 to vector<8x192xbf16>
    %65 = vector.extract_strided_slice %62 {offsets = [0, 0], sizes = [56, 192], strides = [1, 1]} : vector<64x192xbf16> to vector<56x192xbf16>
    %66 = tpu.concatenate %64, %65 in 0 : vector<8x192xbf16>, vector<56x192xbf16> -> vector<64x192xbf16>
    %c0_28 = arith.constant 0 : index
    %c0_29 = arith.constant 0 : index
    %c0_30 = arith.constant 0 : index
    %67 = vector.load %arg7[%c0_28, %c0_29, %c0_30] : memref<3x192x128xbf16, #tpu.memory_space<vmem>>, vector<1x192x128xbf16>
    %68 = vector.shape_cast %67 : vector<1x192x128xbf16> to vector<192x128xbf16>
    %cst_31 = arith.constant dense<0.000000e+00> : vector<64x128xf32>
    %69 = tpu.matmul %66, %68, %cst_31 {dimension_numbers = #tpu.dot_dimension_numbers<[1], [0], [0], [1], [0, 0, 1, 1], [], []>} : vector<64x192xbf16>, vector<192x128xbf16>, vector<64x128xf32> -> vector<64x128xf32>
    %70 = arith.addf %63, %69 : vector<64x128xf32>
    %c1 = arith.constant 1 : index
    %c0_32 = arith.constant 0 : index
    %c0_33 = arith.constant 0 : index
    %71 = vector.load %arg7[%c1, %c0_32, %c0_33] : memref<3x192x128xbf16, #tpu.memory_space<vmem>>, vector<1x192x128xbf16>
    %72 = vector.shape_cast %71 : vector<1x192x128xbf16> to vector<192x128xbf16>
    %cst_34 = arith.constant dense<0.000000e+00> : vector<64x128xf32>
    %73 = tpu.matmul %62, %72, %cst_34 {dimension_numbers = #tpu.dot_dimension_numbers<[1], [0], [0], [1], [0, 0, 1, 1], [], []>} : vector<64x192xbf16>, vector<192x128xbf16>, vector<64x128xf32> -> vector<64x128xf32>
    %74 = arith.addf %70, %73 : vector<64x128xf32>
    %cst_35 = arith.constant 0.000000e+00 : bf16
    %75 = vector.broadcast %cst_35 : bf16 to vector<8x192xbf16>
    %76 = vector.extract_strided_slice %62 {offsets = [8, 0], sizes = [56, 192], strides = [1, 1]} : vector<64x192xbf16> to vector<56x192xbf16>
    %77 = tpu.concatenate %76, %75 in 0 : vector<56x192xbf16>, vector<8x192xbf16> -> vector<64x192xbf16>
    %c2 = arith.constant 2 : index
    %c0_36 = arith.constant 0 : index
    %c0_37 = arith.constant 0 : index
    %78 = vector.load %arg7[%c2, %c0_36, %c0_37] : memref<3x192x128xbf16, #tpu.memory_space<vmem>>, vector<1x192x128xbf16>
    %79 = vector.shape_cast %78 : vector<1x192x128xbf16> to vector<192x128xbf16>
    %cst_38 = arith.constant dense<0.000000e+00> : vector<64x128xf32>
    %80 = tpu.matmul %77, %79, %cst_38 {dimension_numbers = #tpu.dot_dimension_numbers<[1], [0], [0], [1], [0, 0, 1, 1], [], []>} : vector<64x192xbf16>, vector<192x128xbf16>, vector<64x128xf32> -> vector<64x128xf32>
    %81 = arith.addf %74, %80 : vector<64x128xf32>
    %82 = vector.broadcast %47 : vector<1x128xf32> to vector<64x128xf32>
    %83 = arith.addf %81, %82 : vector<64x128xf32>
    %c0_39 = arith.constant 0 : index
    %c0_40 = arith.constant 0 : index
    %84 = vector.load %arg9[%c0_39, %c0_40] : memref<128x32xf32, #tpu.memory_space<vmem>>, vector<128x32xf32>
    %c0_41 = arith.constant 0 : index
    %c0_42 = arith.constant 0 : index
    %85 = vector.load %arg10[%c0_41, %c0_42] : memref<32x128xf32, #tpu.memory_space<vmem>>, vector<32x128xf32>
    %c0_43 = arith.constant 0 : index
    %c0_44 = arith.constant 0 : index
    %86 = vector.load %arg11[%c0_43, %c0_44] : memref<1x128xf32, #tpu.memory_space<vmem>>, vector<1x128xf32>
    %c0_45 = arith.constant 0 : index
    %c0_46 = arith.constant 0 : index
    %87 = vector.load %arg12[%c0_45, %c0_46] : memref<1x128xf32, #tpu.memory_space<vmem>>, vector<1x128xf32>
    %cst_47 = arith.constant dense<0.000000e+00> : vector<128xf32>
    %88 = vector.multi_reduction <add>, %83, %cst_47 [0] : vector<64x128xf32> to vector<128xf32>
    %89 = vector.shape_cast %88 : vector<128xf32> to vector<1x128xf32>
    %90 = arith.mulf %83, %83 : vector<64x128xf32>
    %cst_48 = arith.constant dense<0.000000e+00> : vector<128xf32>
    %91 = vector.multi_reduction <add>, %90, %cst_48 [0] : vector<64x128xf32> to vector<128xf32>
    %92 = vector.shape_cast %91 : vector<128xf32> to vector<1x128xf32>
    %93 = tpu.concatenate %89, %92 in 0 : vector<1x128xf32>, vector<1x128xf32> -> vector<2x128xf32>
    %cst_49 = arith.constant dense<0.000000e+00> : vector<2x32xf32>
    %94 = tpu.matmul %93, %84, %cst_49 {dimension_numbers = #tpu.dot_dimension_numbers<[1], [0], [0], [1], [0, 0, 1, 1], [], []>} : vector<2x128xf32>, vector<128x32xf32>, vector<2x32xf32> -> vector<2x32xf32>
    %cst_50 = arith.constant 3.906250e-03 : f32
    %95 = vector.broadcast %cst_50 : f32 to vector<2x32xf32>
    %96 = arith.mulf %94, %95 : vector<2x32xf32>
    %97 = vector.extract_strided_slice %96 {offsets = [0, 0], sizes = [1, 32], strides = [1, 1]} : vector<2x32xf32> to vector<1x32xf32>
    %98 = vector.extract_strided_slice %96 {offsets = [1, 0], sizes = [1, 32], strides = [1, 1]} : vector<2x32xf32> to vector<1x32xf32>
    %99 = arith.mulf %97, %97 : vector<1x32xf32>
    %100 = arith.subf %98, %99 : vector<1x32xf32>
    %cst_51 = arith.constant 9.99999974E-6 : f32
    %101 = vector.broadcast %cst_51 : f32 to vector<1x32xf32>
    %102 = arith.addf %100, %101 : vector<1x32xf32>
    %103 = math.rsqrt %102 : vector<1x32xf32>
    %104 = tpu.concatenate %97, %103 in 0 : vector<1x32xf32>, vector<1x32xf32> -> vector<2x32xf32>
    %cst_52 = arith.constant dense<0.000000e+00> : vector<2x128xf32>
    %105 = tpu.matmul %104, %85, %cst_52 {dimension_numbers = #tpu.dot_dimension_numbers<[1], [0], [0], [1], [0, 0, 1, 1], [], []>} : vector<2x32xf32>, vector<32x128xf32>, vector<2x128xf32> -> vector<2x128xf32>
    %106 = vector.extract_strided_slice %105 {offsets = [0, 0], sizes = [1, 128], strides = [1, 1]} : vector<2x128xf32> to vector<1x128xf32>
    %107 = vector.extract_strided_slice %105 {offsets = [1, 0], sizes = [1, 128], strides = [1, 1]} : vector<2x128xf32> to vector<1x128xf32>
    %108 = arith.mulf %86, %107 : vector<1x128xf32>
    %109 = arith.mulf %106, %108 : vector<1x128xf32>
    %110 = arith.subf %87, %109 : vector<1x128xf32>
    %111 = vector.broadcast %108 : vector<1x128xf32> to vector<64x128xf32>
    %112 = arith.mulf %83, %111 : vector<64x128xf32>
    %113 = vector.broadcast %110 : vector<1x128xf32> to vector<64x128xf32>
    %114 = arith.addf %112, %113 : vector<64x128xf32>
    %115 = arith.negf %114 : vector<64x128xf32>
    %116 = math.exp %115 : vector<64x128xf32>
    %cst_53 = arith.constant 1.000000e+00 : f32
    %117 = vector.broadcast %cst_53 : f32 to vector<64x128xf32>
    %118 = arith.addf %117, %116 : vector<64x128xf32>
    %119 = arith.divf %117, %118 : vector<64x128xf32>
    %120 = arith.mulf %114, %119 : vector<64x128xf32>
    %121 = arith.truncf %120 : vector<64x128xf32> to vector<64x128xbf16>
    %c0_54 = arith.constant 0 : index
    %c0_55 = arith.constant 0 : index
    %122 = vector.load %arg14[%c0_54, %c0_55] : memref<1x128xf32, #tpu.memory_space<vmem>>, vector<1x128xf32>
    %cst_56 = arith.constant 0.000000e+00 : bf16
    %123 = vector.broadcast %cst_56 : bf16 to vector<1x128xbf16>
    %124 = vector.extract_strided_slice %121 {offsets = [0, 0], sizes = [63, 128], strides = [1, 1]} : vector<64x128xbf16> to vector<63x128xbf16>
    %125 = tpu.concatenate %123, %124 in 0 : vector<1x128xbf16>, vector<63x128xbf16> -> vector<64x128xbf16>
    %cst_57 = arith.constant 0.000000e+00 : bf16
    %126 = vector.shape_cast %5 : vector<64x1xi1> to vector<64x1xi1>
    %127 = vector.broadcast %126 : vector<64x1xi1> to vector<64x128xi1>
    %128 = vector.broadcast %cst_57 : bf16 to vector<64x128xbf16>
    %129 = arith.select %127, %125, %128 : vector<64x128xi1>, vector<64x128xbf16>
    %cst_58 = arith.constant 0.000000e+00 : bf16
    %130 = vector.broadcast %cst_58 : bf16 to vector<1x128xbf16>
    %131 = vector.extract_strided_slice %121 {offsets = [1, 0], sizes = [63, 128], strides = [1, 1]} : vector<64x128xbf16> to vector<63x128xbf16>
    %132 = tpu.concatenate %131, %130 in 0 : vector<63x128xbf16>, vector<1x128xbf16> -> vector<64x128xbf16>
    %cst_59 = arith.constant 0.000000e+00 : bf16
    %133 = vector.shape_cast %8 : vector<64x1xi1> to vector<64x1xi1>
    %134 = vector.broadcast %133 : vector<64x1xi1> to vector<64x128xi1>
    %135 = vector.broadcast %cst_59 : bf16 to vector<64x128xbf16>
    %136 = arith.select %134, %132, %135 : vector<64x128xi1>, vector<64x128xbf16>
    %137 = tpu.concatenate %129, %121, %136 in 1 : vector<64x128xbf16>, vector<64x128xbf16>, vector<64x128xbf16> -> vector<64x384xbf16>
    %cst_60 = arith.constant 0.000000e+00 : f32
    %138 = vector.broadcast %cst_60 : f32 to vector<64x128xf32>
    %cst_61 = arith.constant 0.000000e+00 : bf16
    %139 = vector.broadcast %cst_61 : bf16 to vector<8x384xbf16>
    %140 = vector.extract_strided_slice %137 {offsets = [0, 0], sizes = [56, 384], strides = [1, 1]} : vector<64x384xbf16> to vector<56x384xbf16>
    %141 = tpu.concatenate %139, %140 in 0 : vector<8x384xbf16>, vector<56x384xbf16> -> vector<64x384xbf16>
    %c0_62 = arith.constant 0 : index
    %c0_63 = arith.constant 0 : index
    %c0_64 = arith.constant 0 : index
    %142 = vector.load %arg13[%c0_62, %c0_63, %c0_64] : memref<3x384x128xbf16, #tpu.memory_space<vmem>>, vector<1x384x128xbf16>
    %143 = vector.shape_cast %142 : vector<1x384x128xbf16> to vector<384x128xbf16>
    %cst_65 = arith.constant dense<0.000000e+00> : vector<64x128xf32>
    %144 = tpu.matmul %141, %143, %cst_65 {dimension_numbers = #tpu.dot_dimension_numbers<[1], [0], [0], [1], [0, 0, 1, 1], [], []>} : vector<64x384xbf16>, vector<384x128xbf16>, vector<64x128xf32> -> vector<64x128xf32>
    %145 = arith.addf %138, %144 : vector<64x128xf32>
    %c1_66 = arith.constant 1 : index
    %c0_67 = arith.constant 0 : index
    %c0_68 = arith.constant 0 : index
    %146 = vector.load %arg13[%c1_66, %c0_67, %c0_68] : memref<3x384x128xbf16, #tpu.memory_space<vmem>>, vector<1x384x128xbf16>
    %147 = vector.shape_cast %146 : vector<1x384x128xbf16> to vector<384x128xbf16>
    %cst_69 = arith.constant dense<0.000000e+00> : vector<64x128xf32>
    %148 = tpu.matmul %137, %147, %cst_69 {dimension_numbers = #tpu.dot_dimension_numbers<[1], [0], [0], [1], [0, 0, 1, 1], [], []>} : vector<64x384xbf16>, vector<384x128xbf16>, vector<64x128xf32> -> vector<64x128xf32>
    %149 = arith.addf %145, %148 : vector<64x128xf32>
    %cst_70 = arith.constant 0.000000e+00 : bf16
    %150 = vector.broadcast %cst_70 : bf16 to vector<8x384xbf16>
    %151 = vector.extract_strided_slice %137 {offsets = [8, 0], sizes = [56, 384], strides = [1, 1]} : vector<64x384xbf16> to vector<56x384xbf16>
    %152 = tpu.concatenate %151, %150 in 0 : vector<56x384xbf16>, vector<8x384xbf16> -> vector<64x384xbf16>
    %c2_71 = arith.constant 2 : index
    %c0_72 = arith.constant 0 : index
    %c0_73 = arith.constant 0 : index
    %153 = vector.load %arg13[%c2_71, %c0_72, %c0_73] : memref<3x384x128xbf16, #tpu.memory_space<vmem>>, vector<1x384x128xbf16>
    %154 = vector.shape_cast %153 : vector<1x384x128xbf16> to vector<384x128xbf16>
    %cst_74 = arith.constant dense<0.000000e+00> : vector<64x128xf32>
    %155 = tpu.matmul %152, %154, %cst_74 {dimension_numbers = #tpu.dot_dimension_numbers<[1], [0], [0], [1], [0, 0, 1, 1], [], []>} : vector<64x384xbf16>, vector<384x128xbf16>, vector<64x128xf32> -> vector<64x128xf32>
    %156 = arith.addf %149, %155 : vector<64x128xf32>
    %157 = vector.broadcast %122 : vector<1x128xf32> to vector<64x128xf32>
    %158 = arith.addf %156, %157 : vector<64x128xf32>
    %159 = arith.truncf %1 : vector<64x64xf32> to vector<64x64xbf16>
    %c0_75 = arith.constant 0 : index
    %c0_76 = arith.constant 0 : index
    %160 = vector.load %arg15[%c0_75, %c0_76] : memref<64x128xbf16, #tpu.memory_space<vmem>>, vector<64x128xbf16>
    %cst_77 = arith.constant dense<0.000000e+00> : vector<64x128xf32>
    %161 = tpu.matmul %159, %160, %cst_77 {dimension_numbers = #tpu.dot_dimension_numbers<[1], [0], [0], [1], [0, 0, 1, 1], [], []>} : vector<64x64xbf16>, vector<64x128xbf16>, vector<64x128xf32> -> vector<64x128xf32>
    %c0_78 = arith.constant 0 : index
    %c0_79 = arith.constant 0 : index
    %162 = vector.load %arg16[%c0_78, %c0_79] : memref<1x128xf32, #tpu.memory_space<vmem>>, vector<1x128xf32>
    %163 = vector.broadcast %162 : vector<1x128xf32> to vector<64x128xf32>
    %164 = arith.addf %161, %163 : vector<64x128xf32>
    %165 = arith.addf %158, %164 : vector<64x128xf32>
    %c0_80 = arith.constant 0 : index
    %c0_81 = arith.constant 0 : index
    %c0_82 = arith.constant 0 : index
    %166 = vector.load %arg17[%c0_80, %c0_81, %c0_82] : memref<1x64x128xf32, #tpu.memory_space<vmem>>, vector<1x64x128xf32>
    %167 = vector.shape_cast %166 : vector<1x64x128xf32> to vector<64x128xf32>
    %168 = vector.shape_cast %165 : vector<64x128xf32> to vector<1x64x128xf32>
    tpu.vector_store %arg17[%c0_80, %c0_81, %c0_82], %168 {strides = array<i32>} : memref<1x64x128xf32, #tpu.memory_space<vmem>>, vector<1x64x128xf32>,
    return
  }
  func.func @transform_0(%arg0: i32) -> (i32, i32, i32) {
    %c0_i32 = arith.constant 0 : i32
    %c0_i32_0 = arith.constant 0 : i32
    %c0_i32_1 = arith.constant 0 : i32
    return %arg0, %c0_i32, %c0_i32_0 : i32, i32, i32
  }
  func.func @transform_1(%arg0: i32) -> (i32, i32) {
    %c0_i32 = arith.constant 0 : i32
    %c0_i32_0 = arith.constant 0 : i32
    %c0_i32_1 = arith.constant 0 : i32
    return %c0_i32, %c0_i32_0 : i32, i32
  }
  func.func @transform_2(%arg0: i32) -> (i32, i32) {
    %c0_i32 = arith.constant 0 : i32
    %c0_i32_0 = arith.constant 0 : i32
    %c0_i32_1 = arith.constant 0 : i32
    return %c0_i32, %c0_i32_0 : i32, i32
  }
  func.func @transform_3(%arg0: i32) -> (i32, i32) {
    %c0_i32 = arith.constant 0 : i32
    %c0_i32_0 = arith.constant 0 : i32
    %c0_i32_1 = arith.constant 0 : i32
    return %c0_i32, %c0_i32_0 : i32, i32
  }
  func.func @transform_4(%arg0: i32) -> (i32, i32) {
    %c0_i32 = arith.constant 0 : i32
    %c0_i32_0 = arith.constant 0 : i32
    %c0_i32_1 = arith.constant 0 : i32
    return %c0_i32, %c0_i32_0 : i32, i32
  }
  func.func @transform_5(%arg0: i32) -> (i32, i32) {
    %c0_i32 = arith.constant 0 : i32
    %c0_i32_0 = arith.constant 0 : i32
    %c0_i32_1 = arith.constant 0 : i32
    return %c0_i32, %c0_i32_0 : i32, i32
  }
  func.func @transform_6(%arg0: i32) -> (i32, i32, i32) {
    %c0_i32 = arith.constant 0 : i32
    %c0_i32_0 = arith.constant 0 : i32
    %c0_i32_1 = arith.constant 0 : i32
    %c0_i32_2 = arith.constant 0 : i32
    return %c0_i32, %c0_i32_0, %c0_i32_1 : i32, i32, i32
  }
  func.func @transform_7(%arg0: i32) -> (i32, i32) {
    %c0_i32 = arith.constant 0 : i32
    %c0_i32_0 = arith.constant 0 : i32
    %c0_i32_1 = arith.constant 0 : i32
    return %c0_i32, %c0_i32_0 : i32, i32
  }
  func.func @transform_8(%arg0: i32) -> (i32, i32) {
    %c0_i32 = arith.constant 0 : i32
    %c0_i32_0 = arith.constant 0 : i32
    %c0_i32_1 = arith.constant 0 : i32
    return %c0_i32, %c0_i32_0 : i32, i32
  }
  func.func @transform_9(%arg0: i32) -> (i32, i32) {
    %c0_i32 = arith.constant 0 : i32
    %c0_i32_0 = arith.constant 0 : i32
    %c0_i32_1 = arith.constant 0 : i32
    return %c0_i32, %c0_i32_0 : i32, i32
  }
  func.func @transform_10(%arg0: i32) -> (i32, i32) {
    %c0_i32 = arith.constant 0 : i32
    %c0_i32_0 = arith.constant 0 : i32
    %c0_i32_1 = arith.constant 0 : i32
    return %c0_i32, %c0_i32_0 : i32, i32
  }
  func.func @transform_11(%arg0: i32) -> (i32, i32) {
    %c0_i32 = arith.constant 0 : i32
    %c0_i32_0 = arith.constant 0 : i32
    %c0_i32_1 = arith.constant 0 : i32
    return %c0_i32, %c0_i32_0 : i32, i32
  }
  func.func @transform_12(%arg0: i32) -> (i32, i32, i32) {
    %c0_i32 = arith.constant 0 : i32
    %c0_i32_0 = arith.constant 0 : i32
    %c0_i32_1 = arith.constant 0 : i32
    %c0_i32_2 = arith.constant 0 : i32
    return %c0_i32, %c0_i32_0, %c0_i32_1 : i32, i32, i32
  }
  func.func @transform_13(%arg0: i32) -> (i32, i32) {
    %c0_i32 = arith.constant 0 : i32
    %c0_i32_0 = arith.constant 0 : i32
    %c0_i32_1 = arith.constant 0 : i32
    return %c0_i32, %c0_i32_0 : i32, i32
  }
  func.func @transform_14(%arg0: i32) -> (i32, i32) {
    %c0_i32 = arith.constant 0 : i32
    %c0_i32_0 = arith.constant 0 : i32
    %c0_i32_1 = arith.constant 0 : i32
    return %c0_i32, %c0_i32_0 : i32, i32
  }
  func.func @transform_15(%arg0: i32) -> (i32, i32) {
    %c0_i32 = arith.constant 0 : i32
    %c0_i32_0 = arith.constant 0 : i32
    %c0_i32_1 = arith.constant 0 : i32
    return %c0_i32, %c0_i32_0 : i32, i32
  }
  func.func @transform_16(%arg0: i32) -> (i32, i32, i32) {
    %c0_i32 = arith.constant 0 : i32
    %c0_i32_0 = arith.constant 0 : i32
    %c0_i32_1 = arith.constant 0 : i32
    return %arg0, %c0_i32, %c0_i32_0 : i32, i32, i32
  }
}

</mosaic_0001>

<bundles_post_ra>
// kernel: tpu_custom_call.1
= control target key start
LH: loop header
LB: loop body
LE: loop exit
PB: predicated region body
PF: predicated region fallthrough
CT: control target
= control target key end

     0   :  { %s6090_s0 = inlined_call_operand.hbm [shape: f32[2,64,64], index: 0, kind: input, shape index: {}]   ;;  %s6091_s1 = inlined_call_operand.vmem [shape: f32[64,2], index: 1, kind: input, shape index: {}]   ;;  %s6092_s2 = inlined_call_operand.vmem [shape: f32[64,32], index: 2, kind: input, shape index: {}]   ;;  %s6093_s3 = inlined_call_operand.hbm [shape: f32[32,64], index: 3, kind: input, shape index: {}]   ;;  %s6094_s4 = inlined_call_operand.hbm [shape: f32[1,64], index: 4, kind: input, shape index: {}]   ;;  %s6095_s5 = inlined_call_operand.hbm [shape: f32[1,64], index: 5, kind: input, shape index: {}]   ;;  %s6096_s6 = inlined_call_operand.vmem [shape: bf16[3,192,128], index: 6, kind: input, shape index: {}]   ;;  %s6097_s7 = inlined_call_operand.hbm [shape: f32[1,128], index: 7, kind: input, shape index: {}]   ;;  %s6098_s8 = inlined_call_operand.vmem [shape: f32[128,32], index: 8, kind: input, shape index: {}]   ;;  %s6099_s9 = inlined_call_operand.vmem [shape: f32[32,128], index: 9, kind: input, shape index: {}]   ;;  %s6100_s10 = inlined_call_operand.vmem [shape: f32[1,128], index: 10, kind: input, shape index: {}]   ;;  %s6101_s11 = inlined_call_operand.vmem [shape: f32[1,128], index: 11, kind: input, shape index: {}]   ;;  %s6102_s12 = inlined_call_operand.hbm [shape: bf16[3,384,128], index: 12, kind: input, shape index: {}]   ;;  %s6103_s13 = inlined_call_operand.vmem [shape: f32[1,128], index: 13, kind: input, shape index: {}]   ;;  %s6104_s14 = inlined_call_operand.hbm [shape: bf16[64,128], index: 14, kind: input, shape index: {}]   ;;  %s6105_s15 = inlined_call_operand.vmem [shape: f32[1,128], index: 15, kind: input, shape index: {}]   ;;  %s6106_s16 = inlined_call_operand.hbm [shape: f32[2,64,128], index: 16, kind: output, shape index: {}]  }
   0x1   :  { %6128 = sst [smem:[#allocation20_spill]] %s6090_s0 }
   0x2   :  { %6129 = sst [smem:[#allocation21_spill]] %s6093_s3 }
   0x3   :  { %6130 = sst [smem:[#allocation22_spill]] %s6095_s5 }
   0x4   :  { %6131 = sst [smem:[#allocation23_spill]] %s6098_s8 }
   0x5   :  { %6132 = sst [smem:[#allocation24_spill]] %s6099_s9 }
   0x6   :  { %6133 = sst [smem:[#allocation25_spill]] %s6100_s10 }
   0x7   :  { %6134 = sst [smem:[#allocation26_spill]] %s6101_s11 }
   0x8   :  { %6135 = sst [smem:[#allocation27_spill]] %s6103_s13 }
   0x9   :  { %6136 = sst [smem:[#allocation28_spill]] %s6105_s15 }
   0xa   :  { %6137 = sst [smem:[#allocation29_spill]] %s6106_s16 }
   0xb   :  { %21 = vsyncpa [#allocation3], 0 }
   0xc   :  { %23 = vsyncpa [#allocation3 + $0x1], 0 }
   0xd   :  { %24 = vsyncpa [#allocation6], 0 }
   0xe   :  { %25 = vsyncpa [#allocation9], 0 }
   0xf   :  { %26 = vsyncpa [#allocation12], 0 }
  0x10   :  { %27 = vsyncpa [#allocation4], 0 }
  0x11   :  { %29 = vsyncpa [#allocation4 + $0x1], 0  ;;  %s4921_s21 = smov 0   ;;  %s4923_s22 = smov 0  }
  0x12   :  { %s4925_s23 = smov 0   ;;  %s4927_s24 = smov 0  }
  0x13 LB: > { %s4815_s25 = smov [#allocation5]   ;;  %s4942_s27 = sadd.s32 4294967295, %s4813_s24   ;;  %s4813_s24 = sphi %s4927_s24, %s6250_s24   ;;  %s4809_s23 = sphi %s4925_s23, %s6249_s23   ;;  %s4805_s22 = sphi %s4923_s22, %s6248_s22   ;;  %s4801_s21 = sphi %s4921_s21, %s6247_s21  }
  0x14   : > { %s425_s26 = sshll.u32 %s4815_s25, 4  ;;  %p3489_p0 = scmp.ge.s32.totalorder %s4813_s24, 1  ;;  %s4947_s26 = int_to_ptr.vmem [resolvable:$true] %s425_s26 }
  0x15   : > { %p6113_p1 = scmp.eq.s32.totalorder %s4942_s27, 0  ;;  %p407_p2 = scmp.lt.s32.totalorder %s4813_s24, 3 }
  0x16   : > { %s4816_s29 = smov [#allocation8]   ;;  %s4817_s17 = smov [#allocation11]  }
  0x17   : > { %p4949_p3 = pnand %p3489_p0, %p407_p2  ;;  %s450_s30 = sshll.u32 %s4816_s29, 4  ;;  %s4962_s30 = int_to_ptr.vmem [resolvable:$true] %s450_s30 }
  0x18   : > { %s486_s18 = sshll.u32 %s4817_s17, 4  ;;  %s6140_s3 = sld [smem:[#allocation21_spill]]  ;;  %s4964_s18 = int_to_ptr.vmem [resolvable:$true] %s486_s18 }
  0x19   : > { %s6138_s28 = scalar_select %p4949_p3, 1, 0 }
  0x1a   : > { %p4246_p5 = pneg %p4949_p3 }
  0x1c   : > { %p4958_p6 = pnand %p4246_p5, %p6113_p1 }
  0x1e   : > { %s4537_s25 = scalar_lea.hbm %s6140_s3, 512  ;;  %p4974_p8 = pneg %p4958_p6 }
  0x1f   : > { %p4538_p7 = scmp.ne.s32.totalorder %s6140_s3, %s4537_s25  ;;  %p4544_p11 = scmp.lt.u32.totalorder %s4537_s25, %s6140_s3 }
  0x21   : > { %p4540_p9 = pnand %p4974_p8, %p4538_p7 }
  0x23   : > { %p4541_p10 = pneg %p4540_p9 }
  0x25   : > { %p4546_p12 = pnand %p4544_p11, %p4541_p10 }
  0x27   : > { %4549 = shalt.err (!%p4546_p12)
}
  0x28   : > { %s4550_s15 = scalar_lea.vmem %s4947_s26, 512  ;;  %p4558_p5 = scmp.lt.s32.totalorder %s4947_s26, %s4947_s26 }
  0x29   : > { %p4551_p13 = scmp.ne.s32.totalorder %s4947_s26, %s4550_s15  ;;  %p4559_p4 = scmp.lt.s32.totalorder %s4550_s15, %s4550_s15 }
  0x2b   : > { %p4553_p0 = pnand %p4551_p13, %p4974_p8  ;;  %p4560_p7 = por %p4559_p4, %p4558_p5 }
  0x2d   : > { %p4554_p2 = pneg %p4553_p0 }
  0x2f   : > { %p4561_p9 = pnand %p4560_p7, %p4554_p2 }
  0x31   : > { %4564 = shalt.err (!%p4561_p9)
}
  0x32   : > { %s6111_s16 = smov 128   ;;  %s6112_s13 = smov 8  }
  0x33   : > { %4249 = dma.hbm_to_vmem [thread:$0]  (!%p4958_p6), %s6140_s3, 512, %s4947_s26, [#allocation6], %s6111_s16, %s6111_s16, %s6112_s13  }
  0x34   : > { %s6142_s5 = sld [smem:[#allocation22_spill]] }
  0x3a   : > { %s4565_s15 = scalar_lea.hbm %s6142_s5, 16 }
  0x3b   : > { %p4566_p4 = scmp.ne.s32.totalorder %s6142_s5, %s4565_s15  ;;  %p4572_p12 = scmp.lt.u32.totalorder %s4565_s15, %s6142_s5 }
  0x3d   : > { %p4568_p10 = pnand %p4566_p4, %p4974_p8 }
  0x3f   : > { %p4569_p11 = pneg %p4568_p10 }
  0x41   : > { %p4574_p13 = pnand %p4572_p12, %p4569_p11 }
  0x43   : > { %4577 = shalt.err (!%p4574_p13)
}
  0x44   : > { %s4578_s26 = scalar_lea.vmem %s4962_s30, 16  ;;  %s4585_s10 = scalar_lea.vmem %s4962_s30, 32 }
  0x45   : > { %p4579_p0 = scmp.ne.s32.totalorder %s4962_s30, %s4578_s26  ;;  %p4586_p7 = scmp.lt.s32.totalorder %s4962_s30, %s4962_s30 }
  0x46   : > { %p4587_p9 = scmp.lt.s32.totalorder %s4585_s10, %s4578_s26 }
  0x47   : > { %p4581_p2 = pnand %p4579_p0, %p4974_p8 }
  0x48   : > { %p4588_p4 = por %p4587_p9, %p4586_p7 }
  0x49   : > { %p4582_p5 = pneg %p4581_p2 }
  0x4b   : > { %p4589_p10 = pnand %p4588_p4, %p4582_p5 }
  0x4d   : > { %4592 = shalt.err (!%p4589_p10)
}
  0x4e   : > { %4255 = dma.hbm_to_vmem [thread:$0]  (!%p4958_p6), %s6142_s5, 16, %s4962_s30, [#allocation9]  }
  0x4f   : > { %s4593_s20 = scalar_lea.hbm %s6102_s12, 9216 }
  0x50   : > { %p4594_p11 = scmp.ne.s32.totalorder %s6102_s12, %s4593_s20  ;;  %p4600_p0 = scmp.lt.u32.totalorder %s4593_s20, %s6102_s12 }
  0x52   : > { %p4596_p12 = pnand %p4594_p11, %p4974_p8 }
  0x54   : > { %p4597_p13 = pneg %p4596_p12 }
  0x56   : > { %p4602_p2 = pnand %p4600_p0, %p4597_p13 }
  0x58   : > { %4605 = shalt.err (!%p4602_p2)
}
  0x59   : > { %s4606_s30 = scalar_lea.vmem %s4964_s18, 9216  ;;  %p4614_p4 = scmp.lt.s32.totalorder %s4964_s18, %s4964_s18 }
  0x5a   : > { %p4607_p5 = scmp.ne.s32.totalorder %s4964_s18, %s4606_s30  ;;  %p4615_p10 = scmp.lt.s32.totalorder %s4606_s30, %s4606_s30 }
  0x5c   : > { %p4609_p7 = pnand %p4607_p5, %p4974_p8  ;;  %p4616_p11 = por %p4615_p10, %p4614_p4 }
  0x5e   : > { %p4610_p9 = pneg %p4609_p7 }
  0x60   : > { %p4617_p12 = pnand %p4616_p11, %p4610_p9 }
  0x62   : > { %4620 = shalt.err (!%p4617_p12)
}
  0x63   : > { %s4820_s10 = smov 64   ;;  %s4821_s8 = smov 4  }
  0x64   : > { %4261 = dma.hbm_to_vmem [thread:$0]  (!%p4958_p6), %s6102_s12, 9216, %s4964_s18, [#allocation12], %s4820_s10, %s4820_s10, %s4821_s8  }
  0x65   : > { %s4822_s19 = smov [#allocation7]   ;;  %s4823_s25 = smov [#allocation10]  }
  0x66   : > { %s439_s20 = sshll.u32 %s4822_s19, 4  ;;  %s464_s17 = sshll.u32 %s4823_s25, 4  ;;  %s440_s20 = int_to_ptr.vmem [resolvable:$true] %s439_s20  ;;  %s465_s17 = int_to_ptr.vmem [resolvable:$true] %s464_s17 }
  0x67   : > { %s4621_s30 = scalar_lea.hbm %s6094_s4, 16 }
  0x68   : > { %p4622_p13 = scmp.ne.s32.totalorder %s6094_s4, %s4621_s30  ;;  %p4628_p5 = scmp.lt.u32.totalorder %s4621_s30, %s6094_s4 }
  0x6a   : > { %p4624_p0 = pnand %p4622_p13, %p4974_p8 }
  0x6c   : > { %p4625_p2 = pneg %p4624_p0 }
  0x6e   : > { %p4630_p7 = pnand %p4628_p5, %p4625_p2 }
  0x70   : > { %4633 = shalt.err (!%p4630_p7)
}
  0x71   : > { %s4634_s18 = scalar_lea.vmem %s440_s20, 16  ;;  %s4641_s9 = scalar_lea.vmem %s440_s20, 32 }
  0x72   : > { %p4635_p9 = scmp.ne.s32.totalorder %s440_s20, %s4634_s18  ;;  %p4642_p11 = scmp.lt.s32.totalorder %s440_s20, %s440_s20 }
  0x73   : > { %p4643_p12 = scmp.lt.s32.totalorder %s4641_s9, %s4634_s18 }
  0x74   : > { %p4637_p4 = pnand %p4635_p9, %p4974_p8 }
  0x75   : > { %p4644_p1 = por %p4643_p12, %p4642_p11 }
  0x76   : > { %p4638_p10 = pneg %p4637_p4 }
  0x78   : > { %p4645_p3 = pnand %p4644_p1, %p4638_p10 }
  0x7a   : > { %4648 = shalt.err (!%p4645_p3)
}
  0x7b   : > { %4252 = dma.hbm_to_vmem [thread:$0]  (!%p4958_p6), %s6094_s4, 16, %s440_s20, [#allocation6]  }
  0x7c   : > { %s4649_s11 = scalar_lea.hbm %s6097_s7, 16 }
  0x7d   : > { %p4650_p13 = scmp.ne.s32.totalorder %s6097_s7, %s4649_s11  ;;  %p4656_p3 = scmp.lt.u32.totalorder %s4649_s11, %s6097_s7 }
  0x7f   : > { %p4652_p0 = pnand %p4650_p13, %p4974_p8 }
  0x81   : > { %p4653_p1 = pneg %p4652_p0 }
  0x83   : > { %p4658_p2 = pnand %p4656_p3, %p4653_p1 }
  0x85   : > { %4661 = shalt.err (!%p4658_p2)
}
  0x86   : > { %s4662_s30 = scalar_lea.vmem %s465_s17, 16  ;;  %s4669_s20 = scalar_lea.vmem %s465_s17, 32 }
  0x87   : > { %p4663_p5 = scmp.ne.s32.totalorder %s465_s17, %s4662_s30  ;;  %p4670_p4 = scmp.lt.s32.totalorder %s465_s17, %s465_s17 }
  0x88   : > { %p4671_p10 = scmp.lt.s32.totalorder %s4669_s20, %s4662_s30 }
  0x89   : > { %p4665_p7 = pnand %p4663_p5, %p4974_p8 }
  0x8a   : > { %p4672_p11 = por %p4671_p10, %p4670_p4 }
  0x8b   : > { %p4666_p9 = pneg %p4665_p7 }
  0x8d   : > { %p4673_p12 = pnand %p4672_p11, %p4666_p9 }
  0x8f   : > { %4676 = shalt.err (!%p4673_p12)
}
  0x90   : > { %4258 = dma.hbm_to_vmem [thread:$0]  (!%p4958_p6), %s6097_s7, 16, %s465_s17, [#allocation9]  }
  0x91   : > { %s4824_s16 = smov [#allocation13]   ;;  %s4677_s11 = scalar_lea.hbm %s6104_s14, 512 }
  0x92   : > { %s502_s13 = sshll.u32 %s4824_s16, 4  ;;  %p4678_p13 = scmp.ne.s32.totalorder %s6104_s14, %s4677_s11  ;;  %s503_s13 = int_to_ptr.vmem [resolvable:$true] %s502_s13 }
  0x93   : > { %p4684_p3 = scmp.lt.u32.totalorder %s4677_s11, %s6104_s14 }
  0x94   : > { %p4680_p0 = pnand %p4678_p13, %p4974_p8 }
  0x96   : > { %p4681_p1 = pneg %p4680_p0 }
  0x98   : > { %p4686_p2 = pnand %p4684_p3, %p4681_p1 }
  0x9a   : > { %4689 = shalt.err (!%p4686_p2)
}
  0x9b   : > { %s4690_s17 = scalar_lea.vmem %s503_s13, 512  ;;  %p4698_p4 = scmp.lt.s32.totalorder %s503_s13, %s503_s13 }
  0x9c   : > { %p4691_p5 = scmp.ne.s32.totalorder %s503_s13, %s4690_s17  ;;  %p4699_p10 = scmp.lt.s32.totalorder %s4690_s17, %s4690_s17 }
  0x9e   : > { %p4693_p7 = pnand %p4691_p5, %p4974_p8  ;;  %p4700_p11 = por %p4699_p10, %p4698_p4 }
  0xa0   : > { %p4694_p9 = pneg %p4693_p7 }
  0xa2   : > { %p4701_p12 = pnand %p4700_p11, %p4694_p9 }
  0xa4   : > { %4704 = shalt.err (!%p4701_p12)
}
  0xa5   : > { %4264 = dma.hbm_to_vmem [thread:$0]  (!%p4958_p6), %s6104_s14, 512, %s503_s13, [#allocation12], %s4820_s10, %s4820_s10, %s4821_s8  }
  0xa6   : > { %s3488_s0 = sadd.s32 4294967294, %s4813_s24   ;;  %s5107_s29 = sadd.s32 1, %s4813_s24  }
  0xa7   : > { %s39_s18 = ssub.s32 %s4813_s24, %s5107_s29  ;;  %s42_s9 = sadd.s32 1, %s4809_s23 }
  0xa8   : > { %p40_p8 = scmp.eq.s32.totalorder %s39_s18, 0  ;;  %p49_p13 = scmp.ne.s32.totalorder %s4809_s23, %s4805_s22 }
  0xa9   : > { %p50_p0 = scmp.eq.s32.totalorder %s4813_s24, 0  ;;  %p55_p1 = scmp.ne.s32.totalorder %s4805_s22, %s4801_s21 }
  0xaa   : > { %s5118_s16 = scalar_select %p40_p8, %s4809_s23, %s42_s9  }
  0xab   : > { %p5120_p3 = por %p50_p0, %p49_p13  ;;  %p6144_p2 = scmp.eq.s32.totalorder %s4942_s27, 0 }
  0xac   : > { %p394_p5 = scmp.eq.s32.totalorder %s4942_s27, 1  ;;  %p400_p7 = scmp.eq.s32.totalorder %s3488_s0, 1 }
  0xad   : > { %p5126_p6 = por %p6144_p2, %p55_p1  ;;  %p4279_p9 = scmp.lt.s32.totalorder %s4813_s24, 2 }
  0xae   : > { %s519_s8 = sand.u32 1, %s4809_s23   ;;  %p5133_p4 = por %p394_p5, %p49_p13 }
  0xaf   : > { %p5137_p10 = por %p400_p7, %p55_p1  ;;  %s3497_s11 = sshll.u32 %s519_s8, 6 }
  0xb0   : > { %s6146_s13 = scalar_select %p5133_p4, 1, 0 }
  0xb1   : > { %s6147_s5 = scalar_select %p5137_p10, 1, 0 }
  0xb2   : > { %s3740_s19 = sshll.u32 %s4813_s24, 10  ;;  %s6148_s26 = sld [smem:[#allocation20_spill]] }
  0xb3   : > { %s523_s30 = scalar_lea.vmem [#allocation2], %s3497_s11  ;;  %p5151_p11 = pnand %p4279_p9, %p5120_p3 }
  0xb4   : > { %s530_s20 = sshll.u32 %s523_s30, 4  ;;  %s5155_s18 = scalar_lea.sflag [#allocation3], %s519_s8  ;;  %s5147_s20 = int_to_ptr.vmem [resolvable:$true] %s530_s20 }
  0xb5   : > { %p4707_p8 = pneg %p5151_p11 }
  0xb8   : > { %s5145_s17 = scalar_lea.hbm %s6148_s26, %s3740_s19  ;;  %s4710_s3 = scalar_lea.hbm %s6148_s26, 2048 }
  0xb9   : > { %s4705_s9 = scalar_lea.hbm %s5145_s17, 1024  ;;  %p4711_p1 = scmp.lt.u32.totalorder %s5145_s17, %s6148_s26 }
  0xba   : > { %p4706_p12 = scmp.ne.s32.totalorder %s5145_s17, %s4705_s9  ;;  %p4712_p3 = scmp.lt.u32.totalorder %s4710_s3, %s4705_s9 }
  0xbb   : > { %p4714_p5 = scmp.lt.u32.totalorder %s4705_s9, %s5145_s17 }
  0xbc   : > { %p4708_p13 = pnand %p4707_p8, %p4706_p12  ;;  %p4713_p2 = por %p4712_p3, %p4711_p1 }
  0xbe   : > { %p4709_p0 = pneg %p4708_p13  ;;  %p4715_p7 = por %p4714_p5, %p4713_p2 }
  0xc0   : > { %p4716_p9 = pnand %p4715_p7, %p4709_p0 }
  0xc2   : > { %4719 = shalt.err (!%p4716_p9)
}
  0xc3   : > { %s4720_s8 = scalar_lea.vmem %s5147_s20, 1024  ;;  %s4825_s30 = smov [#allocation2]  }
  0xc4   : > { %p4721_p12 = scmp.ne.s32.totalorder %s5147_s20, %s4720_s8  ;;  %s4725_s11 = sshll.u32 %s4825_s30, 4  ;;  %s4726_s11 = int_to_ptr.vmem [resolvable:$false] %s4725_s11 }
  0xc5   : > { %s4727_s19 = scalar_lea.vmem %s4726_s11, 2048  ;;  %p4728_p4 = scmp.lt.s32.totalorder %s5147_s20, %s4726_s11 }
  0xc6   : > { %p4723_p13 = pnand %p4721_p12, %p4707_p8  ;;  %p4729_p1 = scmp.lt.s32.totalorder %s4727_s19, %s4720_s8 }
  0xc8   : > { %p4724_p10 = pneg %p4723_p13  ;;  %p4730_p3 = por %p4729_p1, %p4728_p4 }
  0xca   : > { %p4731_p2 = pnand %p4730_p3, %p4724_p10 }
  0xcc   : > { %4734 = shalt.err (!%p4731_p2)
}
  0xcd   : > { %s6150_s9 = smov 8   ;;  %s6151_s3 = smov 128  }
  0xce   : > { %4268 = dma.hbm_to_vmem [thread:$0]  (!%p5151_p11), %s5145_s17, 1024, %s5147_s20, %s5155_s18, %s6151_s3, %s6151_s3, %s6150_s9  }
  0xcf   : > { %p6152_p8 = scmp.ne.s32.totalorder %s6138_s28, 0 }
  0xd0   : > { %s5189_s25 = sand.u32 (!%p6152_p8), 1, %s4805_s22  }
  0xd1   : > { %542 = sbr.rel (%p6152_p8) target bundleno = 2013 (0x7dd), region = 84  ;;  %s3501_s15 = sshll.u32 (!%p6152_p8), %s5189_s25, 6 }
  0xd2   : > { %s545_s8 = scalar_lea.sflag (!%p6152_p8), [#allocation3], %s5189_s25  ;;  %s5195_s0 = scalar_lea.vmem (!%p6152_p8), [#allocation2], %s3501_s15 }
  0xd8   : > { %4780 = dma.done.wait (%p5126_p6), %s545_s8, 1024  }
  0xd9   : > { %4782 = vsyncadd (%p5126_p6), %s545_s8, 4294966272  ;;  %p6153_p4 = scmp.eq.s32.totalorder %s4942_s27, 0 }
  0xdb   : > { %4784 = dma.done.wait (%p6153_p4), [#allocation6], 528   ;;  %p6154_p10 = pmov %p6153_p4 }
  0xdc   : > { %p6155_p11 = pmov %p6153_p4 }
  0xdd   : > { %4786 = vsyncadd (%p6154_p10), [#allocation6], 4294966768 }
  0xde   : > { %4788 = dma.done.wait (%p6155_p11), [#allocation9], 32   ;;  %p6156_p0 = pmov %p6153_p4 }
  0xe0   : > { %4790 = vsyncadd (%p6156_p0), [#allocation9], 4294967264  ;;  %p6157_p5 = pmov %p6156_p0 }
  0xe1   : > { %p6158_p7 = pmov %p6156_p0 }
  0xe2   : > { %4792 = dma.done.wait (%p6157_p5), [#allocation12], 9728  }
  0xe3   : > { %4794 = vsyncadd (%p6158_p7), [#allocation12], 4294957568  ;;  %v4826_v0 = vmov 0.0|0.0   ;;  %vm6119_vm0 = vmmov 0   ;;  %v4828_v1 = vmov 0.0   ;;  %v648_v2 = vld [vmem:[%s6092_s2] sm:$0xff] }
  0xe4   : > { %4106 = vmatprep.subr.bf16.mxu0 %v4826_v0  ;;  %3958 = vmatprep.mubr.msk.f32.mxu0 %vm6119_vm0, %v4828_v1  ;;  %v649_v3 = vld [vmem:[%s6092_s2 + $0x8] sm:$0xff]  ;;  %v650_v4 = vld [vmem:[%s6092_s2 + $0x10] sm:$0xff]  ;;  %vm6122_vm1 = vcmask 523264   ;;  %v651_v6 = vld [vmem:[%s6092_s2 + $0x18] sm:$0xff]  ;;  %vm6118_vm2 = vcmask 1040384   ;;  %vm6117_vm10 = vcmask 261120  }
  0xe5   : > { %4118 = vmatprep.subr.bf16.mxu1 %v4826_v0  ;;  %3969 = vmatprep.mubr.msk.f32.mxu1 %vm6119_vm0, %v4828_v1  ;;  %v4107_v5 = vpack.c.bf16 %v649_v3, %v648_v2  ;;  %v652_v7 = vld [vmem:[%s6092_s2 + $0x20] sm:$0xff]  ;;  %v653_v8 = vld [vmem:[%s6092_s2 + $0x28] sm:$0xff]  ;;  %v4110_v10 = vpack.c.bf16 %v651_v6, %v650_v4  ;;  %v5244_v13 = vld [vmem:[%s5195_s0 + $0x10] sm:$0xff]  ;;  %s4832_s20 = smov 64   ;;  %s6210_s9 = sld [smem:[#allocation23_spill]] }
  0xe6   : > { %v5238_v9 = vld [vmem:[%s5195_s0] sm:$0xff]  ;;  %v4113_v11 = vpack.c.bf16 %v653_v8, %v652_v7  ;;  %v5241_v12 = vld [vmem:[%s5195_s0 + $0x8] sm:$0xff]  ;;  %v5247_v14 = vld [vmem:[%s5195_s0 + $0x18] sm:$0xff]  ;;  %v666_v21 = vsel %vm6122_vm1, %v5244_v13, 0.0  ;;  %v686_v32 = vmul.f32 %v5244_v13, %v5244_v13  ;;  %s6212_s28 = sld [smem:[#allocation24_spill]]  ;;  %s6215_s8 = sld [smem:[#allocation25_spill]] }
  0xe7   : > { %4108 = vmatpush3.bf16.msra.mxu0 %v4107_v5  ;;  %v663_v15 = vsel %vm6122_vm1, %v5238_v9, 0.0  ;;  %v684_v16 = vmul.f32 %v5238_v9, %v5238_v9  ;;  %v5255_v17 = vld [vmem:[%s5195_s0 + $0x20] sm:$0xff]  ;;  %v5258_v18 = vld [vmem:[%s5195_s0 + $0x28] sm:$0xff]  ;;  %v5261_v19 = vld [vmem:[%s5195_s0 + $0x30] sm:$0xff]  ;;  %v664_v20 = vsel %vm6122_vm1, %v5241_v12, 0.0  ;;  %v668_v22 = vsel %vm6122_vm1, %v5247_v14, 0.0 }
  0xe8   : > { %4109 = vmatprep.subr.bf16.mxu0 %v4826_v0  ;;  %v685_v23 = vmul.f32 %v5241_v12, %v5241_v12  ;;  %v5272_v24 = vld [vmem:[%s5195_s0 + $0x38] sm:$0xff]  ;;  %v665_v25 = vadd.f32 %v664_v20, %v663_v15  ;;  %v670_v26 = vsel %vm6122_vm1, %v5255_v17, 0.0  ;;  %v672_v27 = vsel %vm6122_vm1, %v5258_v18, 0.0  ;;  %v654_v29 = vld [vmem:[%s6092_s2 + $0x30] sm:$0xff]  ;;  %v656_v15 = vld [vmem:[#allocation5] sm:$0xff]  ;;  %s6241_s30 = sld [smem:[#allocation27_spill]] }
  0xe9   : > { %v674_v28 = vsel %vm6122_vm1, %v5261_v19, 0.0  ;;  %v655_v30 = vld [vmem:[%s6092_s2 + $0x38] sm:$0xff]  ;;  %v676_v31 = vsel %vm6122_vm1, %v5272_v24, 0.0  ;;  %v687_v33 = vmul.f32 %v5247_v14, %v5247_v14  ;;  %v688_v34 = vmul.f32 %v5255_v17, %v5255_v17  ;;  %v658_v20 = vld [vmem:[#allocation5 + $0x10] sm:$0xff]  ;;  %s6242_s3 = sld [smem:[#allocation28_spill]]  ;;  %s3741_s10 = sshll.u32 %s4942_s27, 10 }
  0xea   : > { %v667_v35 = vadd.f32 %v666_v21, %v665_v25  ;;  %v689_v36 = vmul.f32 %v5258_v18, %v5258_v18  ;;  %v690_v37 = vmul.f32 %v5261_v19, %v5261_v19  ;;  %v691_v38 = vmul.f32 %v5272_v24, %v5272_v24  ;;  %v632_v25 = vld [vmem:[%s6091_s1] sm:$0xff]  ;;  %p6244_p9 = scmp.ne.s32.totalorder %s6146_s13, 0  ;;  %s4833_s11 = smov [#allocation14]  }
  0xeb   : > { %4111 = vmatpush3.bf16.msra.mxu0 %v4110_v10  ;;  %v692_v39 = vsel %vm6122_vm1, %v684_v16, 0.0  ;;  %v693_v40 = vsel %vm6122_vm1, %v685_v23, 0.0  ;;  %v695_v41 = vsel %vm6122_vm1, %v686_v32, 0.0  ;;  %v697_v42 = vsel %vm6122_vm1, %v687_v33, 0.0  ;;  %v657_v16 = vld [vmem:[#allocation5 + $0x8] sm:$0xff]  ;;  %v636_v33 = vld [vmem:[%s6091_s1 + $0x20] sm:$0xff] }
  0xec   : > { %4112 = vmatprep.subr.bf16.mxu0 %v4826_v0  ;;  %v669_v43 = vadd.f32 %v668_v22, %v667_v35  ;;  %v694_v44 = vadd.f32 %v693_v40, %v692_v39  ;;  %v699_v45 = vsel %vm6122_vm1, %v688_v34, 0.0  ;;  %v701_v46 = vsel %vm6122_vm1, %v689_v36, 0.0  ;;  %v659_v22 = vld [vmem:[#allocation5 + $0x18] sm:$0xff]  ;;  %v637_v34 = vld [vmem:[%s6091_s1 + $0x28] sm:$0xff]  ;;  %s4739_s19 = sshll.u32 %s4833_s11, 4  ;;  %s4740_s19 = int_to_ptr.vmem [resolvable:$false] %s4739_s19 }
  0xed   : > { %v703_v47 = vsel %vm6122_vm1, %v690_v37, 0.0  ;;  %v705_v48 = vsel %vm6122_vm1, %v691_v38, 0.0  ;;  %v4116_v49 = vpack.c.bf16 %v655_v30, %v654_v29  ;;  %v4119_v21 = vpack.c.bf16 %v657_v16, %v656_v15  ;;  %v634_v30 = vld [vmem:[%s6091_s1 + $0x10] sm:$0xff]  ;;  %v639_v39 = vld [vmem:[%s6091_s1 + $0x38] sm:$0xff] }
  0xee   : > { %v671_v50 = vadd.f32 %v670_v26, %v669_v43  ;;  %v696_v51 = vadd.f32 %v695_v41, %v694_v44  ;;  %v4122_v23 = vpack.c.bf16 %v659_v22, %v658_v20  ;;  %v633_v26 = vld [vmem:[%s6091_s1 + $0x8] sm:$0xff]  ;;  %vm640_vm3 = vcmp.gt.f32.partialorder %v632_v25, 0.5  ;;  %v638_v37 = vld [vmem:[%s6091_s1 + $0x30] sm:$0xff]  ;;  %v4371_v20 = vld [vmem:[%s6096_s6 + $0xb8] sm:$0xff]  }
  0xef   : > { %4114 = vmatpush3.bf16.msra.mxu0 %v4113_v11  ;;  %4120 = vmatpush3.bf16.msra.mxu1 %v4119_v21  ;;  %vm641_vm4 = vcmp.gt.f32.partialorder %v633_v26, 0.5  ;;  %vm642_vm5 = vcmp.gt.f32.partialorder %v634_v30, 0.5  ;;  %vm644_vm6 = vcmp.gt.f32.partialorder %v636_v33, 0.5  ;;  %vm645_vm7 = vcmp.gt.f32.partialorder %v637_v34, 0.5 }
  0xf0   : > { %4115 = vmatprep.subr.bf16.mxu0 %v4826_v0  ;;  %v673_v52 = vadd.f32 %v672_v27, %v671_v50  ;;  %v698_v53 = vadd.f32 %v697_v42, %v696_v51  ;;  %4121 = vmatprep.subr.bf16.mxu1 %v4826_v0  ;;  %v4829_v27 = vmov 1   ;;  %vm646_vm8 = vcmp.gt.f32.partialorder %v638_v37, 0.5  ;;  %v4349_v50 = vld [vmem:[%s6096_s6 + $0x60] sm:$0xff]  }
  0xf1   : > { %4339 = vset.pattern.permute.xlu1 %v4829_v27  ;;  %vm647_vm9 = vcmp.gt.f32.partialorder %v639_v39, 0.5  ;;  %v4350_v51 = vld [vmem:[%s6096_s6] sm:$0xff]   ;;  %v875_v16 = vlaneseq }
  0xf2   : > { %v675_v54 = vadd.f32 %v674_v28, %v673_v52  ;;  %v700_v55 = vadd.f32 %v699_v45, %v698_v53  ;;  %v4830_v28 = vmov 0   ;;  %v4351_v52 = vld [vmem:[%s6096_s6 + $0x68] sm:$0xff]  }
  0xf3   : > { %4117 = vmatpush3.bf16.msra.mxu0 %v4116_v49  ;;  %4123 = vmatpush3.bf16.msra.mxu1 %v4122_v23  ;;  %v1019_v29 = vsel %vm640_vm3, 1, %v4830_v28  ;;  %v1021_v32 = vsel %vm642_vm5, 1, %v4830_v28  ;;  %v5338_v35 = vsel %vm644_vm6, 1, %v4830_v28  ;;  %v1024_v36 = vsel %vm645_vm7, 1, %v4830_v28  ;;  %v4352_v53 = vld [vmem:[%s6096_s6 + $0x8] sm:$0xff]  }
  0xf4   : > { %v677_v56 = vadd.f32 %v676_v31, %v675_v54  ;;  %v702_v57 = vadd.f32 %v701_v46, %v700_v55  ;;  %4338 = vset.pattern.permute.xlu0 %v4830_v28  ;;  %1376 = vmatprep.subr.bf16.mxu1 %v4830_v28  ;;  %v1020_v31 = vsel %vm641_vm4, 1, %v4830_v28  ;;  %v1025_v38 = vsel %vm646_vm8, 1, %v4830_v28  ;;  %v4353_v54 = vld [vmem:[%s6096_s6 + $0x70] sm:$0xff]  }
  0xf5   : > { %1524 = vmatprep.subr.bf16.mxu0 %v4830_v28  ;;  %1115 = vperm.xlu1 %4339, %v1019_v29   ;;  %v5354_v40 = vsel %vm647_vm9, 1, %v4830_v28  ;;  %v4354_v55 = vld [vmem:[%s6096_s6 + $0x10] sm:$0xff]   ;;  %v876_v22 = vshrl.u32 %v875_v16, 7  ;;  %vm6123_vm4 = vsmask.f32 7424  ;;  %vm6121_vm6 = vcmask 1043456  }
  0xf6   : > { %v678_v58 = vrot.slane %v677_v56, 4  ;;  %v704_v59 = vadd.f32 %v703_v47, %v702_v57  ;;  %1028 = vperm.xlu0 %4338, %v1019_v29   ;;  %v4356_v57 = vld [vmem:[%s6096_s6 + $0x18] sm:$0xff]   ;;  %vm6116_vm5 = vsmask.f32 256 }
  0xf7   : > { %v5455_v33 = vsub.s32 0, %v876_v22 }
  0xf8   : > { %v679_v60 = vadd.f32 %v678_v58, %v677_v56  ;;  %v706_v61 = vadd.f32 %v705_v48, %v704_v59  ;;  %v4355_v56 = vld [vmem:[%s6096_s6 + $0x78] sm:$0xff]   ;;  %v4357_v58 = vld [vmem:[%s6096_s6 + $0x80] sm:$0xff]  }
  0xf9   : > { %1118 = vperm.xlu1 %4339, %v1020_v31   ;;  %v4358_v59 = vld [vmem:[%s6096_s6 + $0x20] sm:$0xff]  }
  0xfa   : > { %v680_v62 = vrot.slane %v679_v60, 2  ;;  %v707_v63 = vrot.slane %v706_v61, 4  ;;  %1031 = vperm.xlu0 %4338, %v1020_v31   ;;  %v660_v31 = vld [vmem:[#allocation7] sm:$0x1] }
  0xfc   : > { %v681_v2 = vadd.f32 %v680_v62, %v679_v60  ;;  %v708_v3 = vadd.f32 %v707_v63, %v706_v61  ;;  %v4359_v60 = vld [vmem:[%s6096_s6 + $0x88] sm:$0xff]   ;;  %v4361_v62 = vld [vmem:[%s6096_s6 + $0x90] sm:$0xff]  }
  0xfd   : > { %4340 = vset.pattern.permute.xlu1 %v4830_v28  ;;  %v4360_v61 = vld [vmem:[%s6096_s6 + $0x28] sm:$0xff]   ;;  %v4362_v63 = vld [vmem:[%s6096_s6 + $0x30] sm:$0xff]  }
  0xfe   : > { %v682_v4 = vrot.slane %v681_v2, 1  ;;  %v709_v5 = vrot.slane %v708_v3, 2  ;;  %1034 = vperm.xlu1 %4340, %v1021_v32  }
 0x100   : > { %v710_v6 = vadd.f32 %v709_v5, %v708_v3  ;;  %v683_v7 = vadd.f32 %v682_v4, %v681_v2  ;;  %v4363_v2 = vld [vmem:[%s6096_s6 + $0x98] sm:$0xff]   ;;  %v4365_v4 = vld [vmem:[%s6096_s6 + $0xa0] sm:$0xff]  }
 0x101   : > { %v4364_v3 = vld [vmem:[%s6096_s6 + $0x38] sm:$0xff]   ;;  %v4366_v5 = vld [vmem:[%s6096_s6 + $0x40] sm:$0xff]  }
 0x102   : > { %v711_v8 = vrot.slane %v710_v6, 1  ;;  %4341 = vset.pattern.permute.xlu1 %v4829_v27 }
 0x103   : > { %1121 = vperm.xlu1 %4341, %v1021_v32  }
 0x104   : > { %v712_v10 = vadd.f32 %v711_v8, %v710_v6  ;;  %v4367_v6 = vld [vmem:[%s6096_s6 + $0xa8] sm:$0xff]   ;;  %v4369_v8 = vld [vmem:[%s6096_s6 + $0xb0] sm:$0xff]  }
 0x106   : > { %v714_v11 = vsel %vm6118_vm2, %v683_v7, %v712_v10  ;;  %v4368_v7 = vld [vmem:[%s6096_s6 + $0x48] sm:$0xff]   ;;  %v4370_v10 = vld [vmem:[%s6096_s6 + $0x50] sm:$0xff]  }
 0x107   : > { %3959 = vmatmul.mubr.msk.f32.vlgmr.msra.gmra.mrb[0].mxu0 %vm6122_vm1, %v714_v11  ;;  %4343 = vset.pattern.permute.xlu1 %v4830_v28  ;;  %v4831_v11 = vmov 1966171168  }
 0x108   : > { %1040 = vperm.xlu1 %4343, %v5338_v35   ;;  %1525 = vmatpush1.bf16.msra.mxu0 %v4350_v51  ;;  %v873_v15 = vunpack.c.l.s4 %v4831_v11 }
 0x109   : > { %1526 = vmatprep.subr.bf16.mxu0 %v4830_v28 }
 0x10a   : > { %v874_v21 = vunpack.c.0.s8 %v873_v15 }
 0x10c   : > { %1043 = vperm.xlu1 %4343, %v1024_v36   ;;  %1527 = vmatpush1.bf16.msra.mxu0 %v4352_v53  ;;  %v5451_v23 = vsub.s32 %v874_v21, %v876_v22 }
 0x10d   : > { %1528 = vmatprep.subr.bf16.mxu0 %v4830_v28 }
 0x110   : > { %4344 = vset.pattern.permute.xlu1 %v4829_v27  ;;  %1529 = vmatpush1.bf16.msra.mxu0 %v4354_v55 }
 0x111   : > { %1130 = vperm.xlu1 %4344, %v1024_v36   ;;  %1530 = vmatprep.subr.bf16.mxu0 %v4830_v28  ;;  %v661_v36 = vld [vmem:[#allocation8] sm:$0x1] }
 0x114   : > { %1531 = vmatpush1.bf16.msra.mxu0 %v4356_v57 }
 0x115   : > { %4345 = vset.pattern.permute.xlu1 %v4830_v28  ;;  %1532 = vmatprep.subr.bf16.mxu0 %v4830_v28 }
 0x116   : > { %1046 = vperm.xlu1 %4345, %v1025_v38  }
 0x118   : > { %1533 = vmatpush1.bf16.msra.mxu0 %v4358_v59 }
 0x119   : > { %1534 = vmatprep.subr.bf16.mxu0 %v4830_v28 }
 0x11a   : > { %4347 = vset.pattern.permute.xlu1 %v4829_v27 }
 0x11b   : > { %1133 = vperm.xlu1 %4347, %v1025_v38  }
 0x11c   : > { %1535 = vmatpush1.bf16.msra.mxu0 %v4360_v61 }
 0x11d   : > { %1536 = vmatprep.subr.bf16.mxu0 %v4830_v28 }
 0x11f   : > { %1136 = vperm.xlu1 %4347, %v5354_v40  }
 0x120   : > { %1537 = vmatpush1.bf16.msra.mxu0 %v4362_v63 }
 0x121   : > { %1538 = vmatprep.subr.bf16.mxu0 %v4830_v28 }
 0x124   : > { %1539 = vmatpush1.bf16.msra.mxu0 %v4364_v3 }
 0x125   : > { %1540 = vmatprep.subr.bf16.mxu0 %v4830_v28 }
 0x128   : > { %1541 = vmatpush1.bf16.msra.mxu0 %v4366_v5 }
 0x129   : > { %1542 = vmatprep.subr.bf16.mxu0 %v4830_v28 }
 0x12c   : > { %1543 = vmatpush1.bf16.msra.mxu0 %v4368_v7 }
 0x12d   : > { %1544 = vmatprep.subr.bf16.mxu0 %v4830_v28 }
 0x130   : > { %1545 = vmatpush1.bf16.msra.mxu0 %v4370_v10 }
 0x131   : > { %1546 = vmatprep.subr.bf16.mxu0 %v4830_v28 }
 0x1da   : > { %v784_v41 = vpop.f32.mrb[0].mxu0 }
 0x1db   : > { %v788_v42 = vmul.f32 0.0078125, %v784_v41  ;;  %v3960_v43 = vpop.f32.mrb[1].mxu0 }
 0x1dd   : > { %v789_v44 = vmul.f32 %v788_v42, %v788_v42 }
 0x1df   : > { %v791_v45 = vrot.slane %v789_v44, 7 }
 0x1e1   : > { %v793_v46 = vsub.f32 %v788_v42, %v791_v45 }
 0x1e3   : > { %v794_v47 = vadd.f32 1e-05, %v793_v46 }
 0x1e5   : > { %4461 = vrsqrt.f32 %v794_v47 }
 0x1ef   : > { %v4462_v48 = vpop.eup %4461 }
 0x1f0   : > { %v796_v49 = vsel %vm6118_vm2, %v788_v42, %v4462_v48 }
 0x1f1   : > { %3970 = vmatmul.mubr.msk.f32.vlgmr.msra.gmra.mrb[0].mxu1 %vm6117_vm10, %v796_v49 }
 0x1f2   : > { %1377 = vmatpush1.bf16.msra.mxu1 %v4349_v50 }
 0x1f3   : > { %1378 = vmatprep.subr.bf16.mxu1 %v4830_v28 }
 0x1f6   : > { %1379 = vmatpush1.bf16.msra.mxu1 %v4351_v52 }
 0x1f7   : > { %1380 = vmatprep.subr.bf16.mxu1 %v4830_v28 }
 0x1fa   : > { %1381 = vmatpush1.bf16.msra.mxu1 %v4353_v54 }
 0x1fb   : > { %1382 = vmatprep.subr.bf16.mxu1 %v4830_v28 }
 0x1fe   : > { %1383 = vmatpush1.bf16.msra.mxu1 %v4355_v56 }
 0x1ff   : > { %1384 = vmatprep.subr.bf16.mxu1 %v4830_v28 }
 0x202   : > { %1385 = vmatpush1.bf16.msra.mxu1 %v4357_v58 }
 0x203   : > { %1386 = vmatprep.subr.bf16.mxu1 %v4830_v28 }
 0x206   : > { %1387 = vmatpush1.bf16.msra.mxu1 %v4359_v60 }
 0x207   : > { %1388 = vmatprep.subr.bf16.mxu1 %v4830_v28 }
 0x20a   : > { %1389 = vmatpush1.bf16.msra.mxu1 %v4361_v62 }
 0x20b   : > { %1390 = vmatprep.subr.bf16.mxu1 %v4830_v28 }
 0x20e   : > { %1391 = vmatpush1.bf16.msra.mxu1 %v4363_v2 }
 0x20f   : > { %1392 = vmatprep.subr.bf16.mxu1 %v4830_v28 }
 0x212   : > { %1393 = vmatpush1.bf16.msra.mxu1 %v4365_v4  ;;  %v1116_v4 = vpop.permute.xlu1 %1115 }
 0x213   : > { %1394 = vmatprep.subr.bf16.mxu1 %v4830_v28  ;;  %vm1138_vm11 = vcmp.eq.s32.totalorder %v1116_v4, 1 }
 0x214   : > { %vm1146_vm13 = vmpackc.low %vm1138_vm11, %vm1138_vm11 }
 0x216   : > { %1395 = vmatpush1.bf16.msra.mxu1 %v4367_v6  ;;  %v1119_v21 = vpop.permute.xlu1 %1118 }
 0x217   : > { %1396 = vmatprep.subr.bf16.mxu1 %v4830_v28  ;;  %vm1139_vm12 = vcmp.eq.s32.totalorder %v1119_v21, 1 }
 0x218   : > { %vm1147_vm14 = vmpackc.low %vm1139_vm12, %vm1139_vm12 }
 0x219   : > { %vm5551_vm12 = vmand %vm6118_vm2, %vm6116_vm5 }
 0x21a   : > { %1397 = vmatpush1.bf16.msra.mxu1 %v4369_v8 }
 0x21b   : > { %1398 = vmatprep.subr.bf16.mxu1 %v4830_v28 }
 0x21e   : > { %1399 = vmatpush1.bf16.msra.mxu1 %v4371_v20  ;;  %v4372_v20 = vld [vmem:[%s6096_s6 + $0x58] sm:$0xff]  }
 0x21f   : > { %1693 = vmatprep.subr.bf16.mxu1 %v4830_v28  ;;  %1547 = vmatpush1.bf16.msra.mxu0 %v4372_v20 }
 0x220   : > { %4124 = vmatprep.subr.bf16.mxu0 %v4826_v0 }
 0x2c4   : > { %v867_v25 = vpop.f32.mrb[0].mxu1 }
 0x2c5   : > { %v878_v26 = vrot.slane %v867_v25, %v5451_v23  ;;  %v3971_v29 = vpop.f32.mrb[1].mxu1 }
 0x2c7   : > { %v879_v30 = vcombine.high %v878_v26, %v878_v26 }
 0x2c9   : > { %v886_v32 = vrot.slane %v879_v30, %v5451_v23 }
 0x2cb   : > { %v888_v34 = vmul.f32 %v886_v32, %v660_v31 }
 0x2cd   : > { %v889_v37 = vmul.f32 %v888_v34, %v867_v25  ;;  %v895_v38 = vrot.slane %v888_v34, %v5455_v33  ;;  %v635_v34 = vld [vmem:[%s6091_s1 + $0x18] sm:$0xff] }
 0x2ce   : > { %vm643_vm15 = vcmp.gt.f32.partialorder %v635_v34, 0.5 }
 0x2cf   : > { %v890_v39 = vsub.f32 %v661_v36, %v889_v37  ;;  %v903_v41 = vmul.f32 %v895_v38, %v5261_v19  ;;  %v904_v43 = vmul.f32 %v895_v38, %v5272_v24  ;;  %v897_v44 = vmul.f32 %v895_v38, %v5238_v9 }
 0x2d0   : > { %v898_v45 = vmul.f32 %v895_v38, %v5241_v12  ;;  %v899_v46 = vmul.f32 %v895_v38, %v5244_v13  ;;  %v900_v47 = vmul.f32 %v895_v38, %v5247_v14  ;;  %v901_v48 = vmul.f32 %v895_v38, %v5255_v17 }
 0x2d1   : > { %v909_v42 = vrot.slane %v890_v39, %v5455_v33  ;;  %v902_v24 = vmul.f32 %v895_v38, %v5258_v18  ;;  %v1154_v37 = vsel %vm1146_vm13, 65537, %v4830_v28  ;;  %v1155_v38 = vsel %vm1147_vm14, 65537, %v4830_v28  ;;  %vm5572_vm14 = vmneg %vm6121_vm6 }
 0x2d3   : > { %v917_v49 = vadd.f32 %v909_v42, %v903_v41  ;;  %v918_v50 = vadd.f32 %v909_v42, %v904_v43  ;;  %v911_v51 = vadd.f32 %v909_v42, %v897_v44  ;;  %v5466_v52 = vadd.f32 %v909_v42, %v898_v45 }
 0x2d4   : > { %v5468_v19 = vadd.f32 %v909_v42, %v899_v46  ;;  %v5470_v53 = vadd.f32 %v909_v42, %v900_v47  ;;  %v5473_v55 = vadd.f32 %v909_v42, %v901_v48  ;;  %v5476_v14 = vadd.f32 %v909_v42, %v902_v24 }
 0x2d5   : > { %v3517_v9 = vmul.f32 -1.442695, %v917_v49  ;;  %v3518_v54 = vmul.f32 -1.442695, %v918_v50  ;;  %v3511_v12 = vmul.f32 -1.442695, %v911_v51 }
 0x2d6   : > { %v3512_v13 = vmul.f32 -1.442695, %v5466_v52  ;;  %v3513_v17 = vmul.f32 -1.442695, %v5468_v19  ;;  %v3514_v56 = vmul.f32 -1.442695, %v5470_v53 }
 0x2d7   : > { %4463 = vpow2.f32 %v3517_v9  ;;  %v3515_v57 = vmul.f32 -1.442695, %v5473_v55  ;;  %v3516_v18 = vmul.f32 -1.442695, %v5476_v14  ;;  %v1022_v9 = vsel %vm643_vm15, 1, %v4830_v28 }
 0x2d8   : > { %4465 = vpow2.f32 %v3518_v54 }
 0x2d9   : > { %4467 = vpow2.f32 %v3511_v12 }
 0x2da   : > { %4469 = vpow2.f32 %v3512_v13 }
 0x2db   : > { %4471 = vpow2.f32 %v3513_v17 }
 0x2dc   : > { %4473 = vpow2.f32 %v3514_v56 }
 0x2dd   : > { %4475 = vpow2.f32 %v3515_v57 }
 0x2de   : > { %4477 = vpow2.f32 %v3516_v18 }
 0x2e1   : > { %v4464_v58 = vpop.eup %4463 }
 0x2e2   : > { %v4466_v59 = vpop.eup %4465  ;;  %v949_v60 = vadd.f32 1.0, %v4464_v58 }
 0x2e3   : > { %v4468_v61 = vpop.eup %4467  ;;  %v950_v62 = vadd.f32 1.0, %v4466_v59 }
 0x2e4   : > { %v4470_v63 = vpop.eup %4469  ;;  %4479 = vrcp.f32 %v949_v60  ;;  %v943_v2 = vadd.f32 1.0, %v4468_v61 }
 0x2e5   : > { %v4472_v3 = vpop.eup %4471  ;;  %4481 = vrcp.f32 %v950_v62  ;;  %v944_v5 = vadd.f32 1.0, %v4470_v63 }
 0x2e6   : > { %v4474_v6 = vpop.eup %4473  ;;  %4483 = vrcp.f32 %v943_v2  ;;  %v945_v7 = vadd.f32 1.0, %v4472_v3 }
 0x2e7   : > { %v4476_v8 = vpop.eup %4475  ;;  %4485 = vrcp.f32 %v944_v5  ;;  %v946_v10 = vadd.f32 1.0, %v4474_v6 }
 0x2e8   : > { %v4478_v11 = vpop.eup %4477  ;;  %4487 = vrcp.f32 %v945_v7  ;;  %v947_v15 = vadd.f32 1.0, %v4476_v8 }
 0x2e9   : > { %4489 = vrcp.f32 %v946_v10  ;;  %v948_v16 = vadd.f32 1.0, %v4478_v11 }
 0x2ea   : > { %4491 = vrcp.f32 %v947_v15 }
 0x2eb   : > { %4493 = vrcp.f32 %v948_v16 }
 0x2ee   : > { %v4480_v22 = vpop.eup %4479 }
 0x2ef   : > { %v4482_v25 = vpop.eup %4481  ;;  %v973_v26 = vmul.f32 %v4480_v22, %v917_v49  ;;  %v3523_v49 = vcombine.low %v1154_v37, %v1155_v38  ;;  %v4436_v38 = vld [vmem:[#allocation11 + $0x1c8] sm:$0xff]  }
 0x2f0   : > { %v4484_v29 = vpop.eup %4483  ;;  %v974_v30 = vmul.f32 %v4482_v25, %v918_v50 }
 0x2f1   : > { %v4486_v31 = vpop.eup %4485  ;;  %v967_v32 = vmul.f32 %v4484_v29, %v911_v51  ;;  %vm5505_vm3 = vcmp.ne.s16.totalorder %v3523_v49, 0  ;;  %v1029_v29 = vpop.permute.xlu0 %1028 }
 0x2f2   : > { %v4488_v36 = vpop.eup %4487  ;;  %v5491_v39 = vpack.c.bf16 %v974_v30, %v973_v26  ;;  %v968_v41 = vmul.f32 %v4486_v31, %v5466_v52  ;;  %v1035_v26 = vpop.permute.xlu1 %1034  ;;  %vm1051_vm7 = vcmp.eq.s32.totalorder %v1029_v29, 1 }
 0x2f3   : > { %v4490_v42 = vpop.eup %4489  ;;  %v969_v43 = vmul.f32 %v4488_v36, %v5468_v19  ;;  %vm1059_vm9 = vmpackc.low %vm1051_vm7, %vm1051_vm7  ;;  %vm1053_vm15 = vcmp.eq.s32.totalorder %v1035_v26, 1 }
 0x2f4   : > { %v4492_v44 = vpop.eup %4491  ;;  %1192 = vrot.lane.b32.xlu1 %v5491_v39, %s4832_s20  ;;  %v975_v45 = vpack.c.bf16 %v968_v41, %v967_v32  ;;  %v970_v46 = vmul.f32 %v4490_v42, %v5470_v53  ;;  %v1005_v47 = vshrl.u32 %v5491_v39, 16  ;;  %v1067_v34 = vsel %vm1059_vm9, 65537, %v4830_v28  ;;  %v4373_v42 = vld [vmem:[%s6096_s6 + $0xc0] sm:$0xff]   ;;  %vm5597_vm9 = vmpackc.low %vm1053_vm15, %vm1053_vm15 }
 0x2f5   : > { %v4494_v48 = vpop.eup %4493  ;;  %v971_v50 = vmul.f32 %v4492_v44, %v5473_v55  ;;  %v1008_v55 = vshll.u32 %v5491_v39, 16  ;;  %v1032_v31 = vpop.permute.xlu0 %1031 }
 0x2f6   : > { %1186 = vrot.lane.b32.xlu0 %v975_v45, %s4832_s20  ;;  %v982_v51 = vshrl.u32 %v975_v45, 16  ;;  %v985_v52 = vshll.u32 %v975_v45, 16  ;;  %v976_v19 = vpack.c.bf16 %v970_v46, %v969_v43  ;;  %v972_v24 = vmul.f32 %v4494_v48, %v5476_v14  ;;  %v1122_v30 = vpop.permute.xlu1 %1121 }
 0x2f7   : > { %v1007_v54 = vrot.slane %v1005_v47, 7  ;;  %v5522_v11 = vrot.slane %v1008_v55, 1  ;;  %vm1052_vm8 = vcmp.eq.s32.totalorder %v1032_v31, 1  ;;  %v6165_v48 = vmov 0 }
 0x2f8   : > { %v1096_v12 = vrot.slane %v985_v52, 1  ;;  %v992_v53 = vshll.u32 %v976_v19, 16  ;;  %v977_v13 = vpack.c.bf16 %v972_v24, %v971_v50  ;;  %v984_v17 = vrot.slane %v982_v51, 7  ;;  %vm1060_vm11 = vmpackc.low %vm1052_vm8, %vm1052_vm8  ;;  %v4374_v50 = vld [vmem:[%s6096_s6 + $0xc8] sm:$0xff]  }
 0x2f9   : > { %v989_v57 = vshrl.u32 %v976_v19, 16  ;;  %v1010_v62 = vor.u32 %v1008_v55, %v1007_v54  ;;  %v1068_v36 = vsel %vm1060_vm11, 65537, %v4830_v28  ;;  %v6166_v48 = vsel %vm5572_vm14, 4294967295, %v6165_v48 }
 0x2fa   : > { %1037 = vperm.xlu0 %4338, %v1022_v9   ;;  %v1097_v18 = vor.u32 %v1096_v12, %v982_v51  ;;  %v1098_v14 = vrot.slane %v992_v53, 1  ;;  %v997_v58 = vshrl.u32 %v977_v13, 16  ;;  %v1000_v59 = vshll.u32 %v977_v13, 16  ;;  %v1041_v32 = vpop.permute.xlu1 %1040 }
 0x2fb   : > { %v987_v60 = vor.u32 %v985_v52, %v984_v17  ;;  %v991_v61 = vrot.slane %v989_v57, 7  ;;  %v3519_v37 = vcombine.low %v1067_v34, %v1068_v36  ;;  %v4375_v52 = vld [vmem:[%s6096_s6 + $0xd0] sm:$0xff]   ;;  %vm1140_vm11 = vcmp.eq.s32.totalorder %v1122_v30, 1 }
 0x2fc   : > { %v1099_v63 = vsel %vm6123_vm4, %v1097_v18, %v1098_v14  ;;  %v999_v2 = vrot.slane %v997_v58, 7  ;;  %v1100_v3 = vor.u32 %v1098_v14, %v989_v57  ;;  %v1101_v4 = vrot.slane %v1000_v59, 1 }
 0x2fd   : > { %v5513_v5 = vsel %vm5505_vm3, %v1099_v63, 0  ;;  %v994_v6 = vor.u32 %v992_v53, %v991_v61  ;;  %vm5555_vm13 = vcmp.ne.s16.totalorder %v3519_v37, 0  ;;  %v1018_v41 = vsel %vm5551_vm12, 0, %v987_v60  ;;  %v4378_v53 = vld [vmem:[%s6096_s6 + $0xe8] sm:$0xff]  }
 0x2fe   : > { %4342 = vset.pattern.permute.xlu0 %v4829_v27  ;;  %v1220_v7 = vrot.slane %v5513_v5, 4  ;;  %3563 = vmatprep.mubr.msk.bf16.mxu1 %vm6122_vm1, %v5513_v5  ;;  %v5520_v8 = vsel %vm6123_vm4, %v1100_v3, %v1101_v4  ;;  %v1103_v10 = vor.u32 %v1101_v4, %v997_v58  ;;  %v1002_v16 = vor.u32 %v1000_v59, %v999_v2  ;;  %v4424_v4 = vld [vmem:[#allocation11 + $0x68] sm:$0xff]  }
 0x2ff   : > { %1124 = vperm.xlu0 %4342, %v1022_v9   ;;  %v5525_v15 = vsel %vm6116_vm5, %v984_v17, %v994_v6  ;;  %v5528_v20 = vsel %vm6116_vm5, %v999_v2, %v1010_v62  ;;  %v1091_v45 = vsel %vm5555_vm13, %v1018_v41, 0  ;;  %v4377_v9 = vld [vmem:[%s6096_s6 + $0xe0] sm:$0xff]   ;;  %vm1055_vm10 = vcmp.eq.s32.totalorder %v1041_v32, 1 }
 0x300   : > { %v1242_v21 = vsel %vm6121_vm6, 0, %v1220_v7  ;;  %v5535_v22 = vsel %vm6123_vm4, %v1103_v10, %v5522_v11  ;;  %v5539_v25 = vsel %vm6116_vm5, %v991_v61, %v1002_v16  ;;  %vm5605_vm4 = vmpackc.low %vm1140_vm11, %vm1140_vm11  ;;  %v1069_v14 = vsel %vm5597_vm9, 65537, %v4830_v28  ;;  %v4379_v61 = vld [vmem:[%s6096_s6 + $0xf0] sm:$0xff]  }
 0x301   : > { %3579 = vmatprep.mubr.msk.bf16.mxu0 %vm6122_vm1, %v1242_v21  ;;  %v1106_v63 = vor.u32 %v5522_v11, %v1005_v47  ;;  %v1156_v2 = vsel %vm5605_vm4, 65537, %v4830_v28  ;;  %v4380_v11 = vld [vmem:[%s6096_s6 + $0xf8] sm:$0xff]  }
 0x303   : > { %1127 = vperm.xlu0 %4342, %v5338_v35   ;;  %v1044_v35 = vpop.permute.xlu1 %1043 }
 0x304   : > { %vm1056_vm6 = vcmp.eq.s32.totalorder %v1044_v35, 1 }
 0x307   : > { %1188 = vrot.lane.b32.xlu0 %v976_v19, %s4832_s20  ;;  %v4376_v19 = vld [vmem:[%s6096_s6 + $0xd8] sm:$0xff]  }
 0x308   : > { %4346 = vset.pattern.permute.xlu0 %v4830_v28 }
 0x30b   : > { %1049 = vperm.xlu0 %4346, %v5354_v40   ;;  %v1131_v40 = vpop.permute.xlu1 %1130 }
 0x30c   : > { %vm1143_vm15 = vcmp.eq.s32.totalorder %v1131_v40, 1 }
 0x30f   : > { %1190 = vrot.lane.b32.xlu0 %v977_v13, %s4832_s20  ;;  %v5564_v43 = vpop.permute.xlu1 %1046  ;;  %v4383_v13 = vld [vmem:[%s6096_s6 + $0x110] sm:$0xff]   ;;  %s6216_s20 = sld [smem:[#allocation26_spill]] }
 0x310   : > { %4348 = vset.pattern.permute.xlu0 %v4829_v27  ;;  %v4413_v27 = vld [vmem:[#allocation11 + $0x8] sm:$0xff]  }
 0x313   : > { %v1134_v51 = vpop.permute.xlu1 %1133 }
 0x314   : > { %vm1144_vm7 = vcmp.eq.s32.totalorder %v1134_v51, 1 }
 0x315   : > { %vm1152_vm5 = vmpackc.low %vm1144_vm7, %vm1144_vm7 }
 0x316   : > { %vm5611_vm7 = vmpackc.low %vm1055_vm10, %vm1055_vm10  ;;  %v1160_v57 = vsel %vm1152_vm5, 65537, %v4830_v28  ;;  %vm6175_vm5 = vsmask.f32 7424 }
 0x317   : > { %v1137_v24 = vpop.permute.xlu1 %1136  ;;  %v1071_v16 = vsel %vm5611_vm7, 65537, %v4830_v28 }
 0x318   : > { %vm1145_vm8 = vcmp.eq.s32.totalorder %v1137_v24, 1 }
 0x319   : > { %vm1153_vm2 = vmpackc.low %vm1145_vm8, %vm1145_vm8 }
 0x31a   : > { %v1161_v18 = vsel %vm1153_vm2, 65537, %v4830_v28  ;;  %vm1151_vm8 = vmpackc.low %vm1143_vm15, %vm1143_vm15 }
 0x31b   : > { %v3526_v62 = vcombine.low %v1160_v57, %v1161_v18  ;;  %v1159_v39 = vsel %vm1151_vm8, 65537, %v4830_v28 }
 0x31d   : > { %vm5654_vm11 = vcmp.ne.s16.totalorder %v3526_v62, 0 }
 0x366   : > { %v1193_v57 = vpop.permute.xlu1 %1192 }
 0x368   : > { %v1187_v44 = vpop.permute.xlu0 %1186 }
 0x369   : > { %v5569_v46 = vsel %vm6122_vm1, %v1091_v45, %v1187_v44 }
 0x36a   : > { %v1219_v49 = vrot.slane %v5569_v46, 4  ;;  %1409 = vmatmul.mubr.bf16.vlgmr.msra.gmra.mrb[4].mxu1 %v5569_v46 }
 0x36b   : > { %1694 = vmatpush1.bf16.msra.mxu1 %v4373_v42 }
 0x36c   : > { %3581 = vmatmul.mubr.msk.bf16.vlgmr.msra.gmra.mrb[4].mxu0 %vm5572_vm14, %v1219_v49  ;;  %1695 = vmatprep.subr.bf16.mxu1 %v4830_v28 }
 0x36f   : > { %1696 = vmatpush1.bf16.msra.mxu1 %v4374_v50 }
 0x370   : > { %1697 = vmatprep.subr.bf16.mxu1 %v4830_v28 }
 0x373   : > { %1698 = vmatpush1.bf16.msra.mxu1 %v4375_v52 }
 0x374   : > { %1699 = vmatprep.subr.bf16.mxu1 %v4830_v28 }
 0x377   : > { %1700 = vmatpush1.bf16.msra.mxu1 %v4376_v19 }
 0x378   : > { %1701 = vmatprep.subr.bf16.mxu1 %v4830_v28 }
 0x379   : > { %v1038_v12 = vpop.permute.xlu0 %1037 }
 0x37a   : > { %vm1054_vm0 = vcmp.eq.s32.totalorder %v1038_v12, 1 }
 0x37b   : > { %vm1062_vm1 = vmpackc.low %vm1054_vm0, %vm1054_vm0  ;;  %1702 = vmatpush1.bf16.msra.mxu1 %v4377_v9 }
 0x37c   : > { %v1070_v17 = vsel %vm1062_vm1, 65537, %v4830_v28  ;;  %1703 = vmatprep.subr.bf16.mxu1 %v4830_v28  ;;  %vm5620_vm0 = vmpackc.low %vm1056_vm6, %vm1056_vm6  ;;  %vm1111_vm1 = vcmask 1047552  }
 0x37d   : > { %v3520_v60 = vcombine.low %v1069_v14, %v1070_v17  ;;  %vm5636_vm6 = vmand %vm1111_vm1, %vm6175_vm5  ;;  %v1072_v21 = vsel %vm5620_vm0, 65537, %v4830_v28  ;;  %vm6184_vm0 = vcmask 523264   ;;  %vm1057_vm1 = vcmp.eq.s32.totalorder %v5564_v43, 1 }
 0x37e   : > { %v1125_v59 = vpop.permute.xlu0 %1124  ;;  %v1113_v30 = vsel %vm5636_vm6, %v1106_v63, 0  ;;  %v3521_v40 = vcombine.low %v1071_v16, %v1072_v21  ;;  %vm6185_vm8 = vmmov %vm6184_vm0  ;;  %v6198_v17 = vmov 0  ;;  %v1782_v63 = vld [vmem:[%s6210_s9 + $0x10] sm:$0xff] }
 0x37f   : > { %vm1141_vm10 = vcmp.eq.s32.totalorder %v1125_v59, 1  ;;  %1704 = vmatpush1.bf16.msra.mxu1 %v4378_v53  ;;  %vm5644_vm9 = vcmp.ne.s16.totalorder %v3520_v60, 0  ;;  %v1181_v42 = vsel %vm5654_vm11, %v1113_v30, 0  ;;  %vm6189_vm5 = vmmov %vm6184_vm0  ;;  %v4384_v59 = vld [vmem:[%s6096_s6 + $0x118] sm:$0xff]   ;;  %v1788_v30 = vld [vmem:[%s6210_s9 + $0x40] sm:$0xff] }
 0x380   : > { %vm1149_vm2 = vmpackc.low %vm1141_vm10, %vm1141_vm10  ;;  %1705 = vmatprep.subr.bf16.mxu1 %v4830_v28  ;;  %v1092_v37 = vsel %vm5644_vm9, %v5525_v15, 0  ;;  %v1231_v5 = vrot.slane %v1181_v42, 4 }
 0x381   : > { %v1157_v3 = vsel %vm1149_vm2, 65537, %v4830_v28  ;;  %vm6188_vm2 = vcmask 1043456  }
 0x382   : > { %v3524_v6 = vcombine.low %v1156_v2, %v1157_v3  ;;  %v1128_v10 = vpop.permute.xlu0 %1127  ;;  %v1783_v2 = vld [vmem:[%s6210_s9 + $0x18] sm:$0xff] }
 0x383   : > { %vm1142_vm4 = vcmp.eq.s32.totalorder %v1128_v10, 1  ;;  %1706 = vmatpush1.bf16.msra.mxu1 %v4379_v61  ;;  %v1781_v61 = vld [vmem:[%s6210_s9 + $0x8] sm:$0xff]  ;;  %v4128_v3 = vpack.c.bf16 %v1783_v2, %v1782_v63 }
 0x384   : > { %vm5658_vm15 = vcmp.ne.s16.totalorder %v3524_v6, 0  ;;  %vm1150_vm7 = vmpackc.low %vm1142_vm4, %vm1142_vm4  ;;  %1707 = vmatprep.subr.bf16.mxu1 %v4830_v28  ;;  %v1784_v6 = vld [vmem:[%s6210_s9 + $0x20] sm:$0xff]  ;;  %v1785_v10 = vld [vmem:[%s6210_s9 + $0x28] sm:$0xff] }
 0x385   : > { %v1158_v31 = vsel %vm1150_vm7, 65537, %v4830_v28  ;;  %v1179_v32 = vsel %vm5658_vm15, %v5520_v8, 0  ;;  %v4381_v8 = vld [vmem:[%s6096_s6 + $0x100] sm:$0xff]   ;;  %vm1065_vm4 = vmpackc.low %vm1057_vm1, %vm1057_vm1  ;;  %v4131_v16 = vpack.c.bf16 %v1785_v10, %v1784_v6 }
 0x386   : > { %v3525_v35 = vcombine.low %v1158_v31, %v1159_v39  ;;  %v1189_v34 = vpop.permute.xlu0 %1188  ;;  %v1223_v36 = vrot.slane %v1179_v32, 4  ;;  %3564 = vmatprep.mubr.msk.bf16.mxu1 %vm6184_vm0, %v1179_v32  ;;  %vm6190_vm7 = vmmov %vm6184_vm0  ;;  %v1073_v46 = vsel %vm1065_vm4, 65537, %v4830_v28  ;;  %v1786_v39 = vld [vmem:[%s6210_s9 + $0x30] sm:$0xff]  ;;  %v1789_v31 = vld [vmem:[%s6210_s9 + $0x48] sm:$0xff] }
 0x387   : > { %v1200_v41 = vsel %vm6185_vm8, %v1092_v37, %v1189_v34  ;;  %1708 = vmatpush1.bf16.msra.mxu1 %v4380_v11  ;;  %vm6191_vm0 = vmmov %vm6188_vm2  ;;  %vm5696_vm8 = vcmp.ne.s16.totalorder %v3521_v40, 0  ;;  %v1787_v11 = vld [vmem:[%s6210_s9 + $0x38] sm:$0xff]  ;;  %v4137_v32 = vpack.c.bf16 %v1789_v31, %v1788_v30  ;;  %v1793_v40 = vld [vmem:[%s6210_s9 + $0x68] sm:$0xff] }
 0x388   : > { %vm5680_vm10 = vcmp.ne.s16.totalorder %v3525_v35, 0  ;;  %v1221_v45 = vrot.slane %v1200_v41, 4  ;;  %1417 = vmatmul.mubr.bf16.gmra.mrb[8].mxu1 %v1200_v41  ;;  %v1224_v15 = vsel %vm6188_vm2, %v1220_v7, %v1223_v36  ;;  %1709 = vmatprep.subr.bf16.mxu1 %v4830_v28  ;;  %v1093_v12 = vsel %vm5696_vm8, %v5539_v25, 0  ;;  %v1790_v35 = vld [vmem:[%s6210_s9 + $0x50] sm:$0xff]  ;;  %v1791_v34 = vld [vmem:[%s6210_s9 + $0x58] sm:$0xff]  ;;  %v4446_v7 = vld [vmem:[#allocation11 + $0x1a0] sm:$0xff]  }
 0x389   : > { %3582 = vmatprep.mubr.msk.bf16.mxu0 %vm6189_vm5, %v1224_v15  ;;  %v1180_v43 = vsel %vm5680_vm10, %v5535_v22, 0  ;;  %v4382_v22 = vld [vmem:[%s6096_s6 + $0x108] sm:$0xff]   ;;  %vm6194_vm5 = vmmov %vm6191_vm0  ;;  %v4134_v21 = vpack.c.bf16 %v1787_v11, %v1786_v39  ;;  %v4140_v37 = vpack.c.bf16 %v1791_v34, %v1790_v35 }
 0x38a   : > { %v1050_v50 = vpop.permute.xlu0 %1049  ;;  %v1227_v51 = vrot.slane %v1180_v43, 4  ;;  %3565 = vmatprep.mubr.msk.bf16.mxu1 %vm6190_vm7, %v1180_v43  ;;  %v1222_v52 = vsel %vm6191_vm0, %v1219_v49, %v1221_v45  ;;  %vm6195_vm7 = vmmov %vm6191_vm0  ;;  %vm6196_vm0 = vcmask 523264  }
 0x38b   : > { %vm1058_vm2 = vcmp.eq.s32.totalorder %v1050_v50, 1  ;;  %1565 = vmatmul.mubr.bf16.gmra.mrb[8].mxu0 %v1222_v52  ;;  %1710 = vmatpush1.bf16.msra.mxu1 %v4381_v8  ;;  %vm6197_vm14 = vmmov %vm6196_vm0  ;;  %v1795_v8 = vld [vmem:[%s6210_s9 + $0x78] sm:$0xff] }
 0x38c   : > { %vm1066_vm1 = vmpackc.low %vm1058_vm2, %vm1058_vm2  ;;  %v1228_v19 = vsel %vm6194_vm5, %v1223_v36, %v1227_v51  ;;  %v1232_v24 = vsel %vm6195_vm7, %v1227_v51, %v1231_v5  ;;  %1711 = vmatprep.subr.bf16.mxu1 %v4830_v28  ;;  %v1792_v36 = vld [vmem:[%s6210_s9 + $0x60] sm:$0xff] }
 0x38d   : > { %v1074_v49 = vsel %vm1066_vm1, 65537, %v4830_v28  ;;  %3583 = vmatprep.mubr.msk.bf16.mxu0 %vm6196_vm0, %v1228_v19  ;;  %vm6200_vm4 = vmmov %vm6196_vm0  ;;  %v4143_v41 = vpack.c.bf16 %v1793_v40, %v1792_v36 }
 0x38e   : > { %v3522_v9 = vcombine.low %v1073_v46, %v1074_v49  ;;  %v1191_v54 = vpop.permute.xlu0 %1190  ;;  %vm6202_vm1 = vmmov %vm6196_vm0 }
 0x38f   : > { %v1204_v53 = vsel %vm6197_vm14, %v1093_v12, %v1191_v54  ;;  %1712 = vmatpush1.bf16.msra.mxu1 %v4382_v22  ;;  %vm6201_vm14 = vmmov %vm6194_vm5 }
 0x390   : > { %vm5716_vm2 = vcmp.ne.s16.totalorder %v3522_v9, 0  ;;  %v1225_v55 = vrot.slane %v1204_v53, 4  ;;  %1425 = vmatmul.mubr.bf16.gmra.mrb[12].mxu1 %v1204_v53  ;;  %1713 = vmatprep.subr.bf16.mxu1 %v4830_v28  ;;  %vm6203_vm5 = vmmov %vm6196_vm0 }
 0x391   : > { %v6199_v17 = vsel %vm5716_vm2, 4294967295, %v6198_v17  ;;  %3566 = vmatprep.mubr.msk.bf16.mxu1 %vm6200_vm4, %v1181_v42  ;;  %v1094_v25 = vsel %vm5716_vm2, %v5528_v20, 0  ;;  %vm6204_vm4 = vmmov 0   ;;  %vm6208_vm2 = vmmov %vm6196_vm0  ;;  %v1794_v42 = vld [vmem:[%s6210_s9 + $0x70] sm:$0xff] }
 0x392   : > { %v1226_v18 = vsel %vm6201_vm14, %v1221_v45, %v1225_v55  ;;  %v1208_v14 = vsel %vm6202_vm1, %v1094_v25, %v1193_v57  ;;  %vm6205_vm14 = vmmov %vm6196_vm0  ;;  %v4146_v45 = vpack.c.bf16 %v1795_v8, %v1794_v42  ;;  %v3626_v42 = vld [vmem:[#allocation10] ss:$0 sm:$0xff] }
 0x393   : > { %1573 = vmatmul.mubr.bf16.gmra.mrb[12].mxu0 %v1226_v18  ;;  %v1229_v58 = vrot.slane %v1208_v14, 4  ;;  %1714 = vmatpush1.bf16.msra.mxu1 %v4383_v13  ;;  %vm6206_vm1 = vmmov %vm6196_vm0 }
 0x394   : > { %3584 = vmatprep.mubr.msk.bf16.mxu0 %vm6203_vm5, %v1232_v24  ;;  %1715 = vmatprep.subr.bf16.mxu1 %v4830_v28  ;;  %vm6207_vm5 = vmmov %vm6195_vm7  ;;  %v1780_v28 = vld [vmem:[%s6210_s9] sm:$0xff] }
 0x395   : > { %v1230_v60 = vsel %vm6195_vm7, %v1225_v55, %v1229_v58  ;;  %v1593_v20 = vsel %vm6207_vm5, %v1231_v5, 0  ;;  %vm6209_vm7 = vmmov %vm6207_vm5  ;;  %v4125_v62 = vpack.c.bf16 %v1781_v61, %v1780_v28  ;;  %vm6220_vm5 = vsmask.f32 256 }
 0x397   : > { %1716 = vmatpush1.bf16.msra.mxu1 %v4384_v59  ;;  %4126 = vmatpush3.bf16.msra.mxu0 %v4125_v62 }
 0x398   : > { %1433 = vmatmul.mubr.bf16.gmra.mrb[16].mxu1 %v1208_v14  ;;  %4127 = vmatprep.subr.bf16.mxu0 %v4826_v0 }
 0x399   : > { %3621 = vmatprep.mubr.msk.bf16.mxu1 %vm6196_vm0, %v1224_v15 }
 0x39b   : > { %1581 = vmatmul.mubr.bf16.gmra.mrb[16].mxu0 %v1230_v60 }
 0x39c   : > { %4004 = vmatprep.mubr.msk.f32.mxu0 %vm6204_vm4, %v4828_v1  ;;  %4129 = vmatpush3.bf16.msra.mxu0 %v4128_v3 }
 0x39d   : > { %4130 = vmatprep.subr.bf16.mxu0 %v4826_v0 }
 0x3a0   : > { %1726 = vmatmul.mubr.bf16.vlgmr.msra.gmra.mrb[20].mxu1 %v1222_v52  ;;  %4132 = vmatpush3.bf16.msra.mxu0 %v4131_v16 }
 0x3a1   : > { %3622 = vmatprep.mubr.msk.bf16.mxu1 %vm6205_vm14, %v1228_v19  ;;  %4133 = vmatprep.subr.bf16.mxu0 %v4826_v0  ;;  %vm6217_vm14 = vsmask.f32 7424 }
 0x3a4   : > { %4135 = vmatpush3.bf16.msra.mxu0 %v4134_v21 }
 0x3a5   : > { %4136 = vmatprep.subr.bf16.mxu0 %v4826_v0 }
 0x3a8   : > { %1734 = vmatmul.mubr.bf16.gmra.mrb[24].mxu1 %v1226_v18  ;;  %4138 = vmatpush3.bf16.msra.mxu0 %v4137_v32 }
 0x3a9   : > { %3623 = vmatprep.mubr.msk.bf16.mxu1 %vm6206_vm1, %v1232_v24  ;;  %4139 = vmatprep.subr.bf16.mxu0 %v4826_v0 }
 0x3ac   : > { %4141 = vmatpush3.bf16.msra.mxu0 %v4140_v37 }
 0x3ad   : > { %4142 = vmatprep.subr.bf16.mxu0 %v4826_v0 }
 0x3b0   : > { %1742 = vmatmul.mubr.bf16.gmra.mrb[28].mxu1 %v1230_v60  ;;  %4144 = vmatpush3.bf16.msra.mxu0 %v4143_v41 }
 0x3b1   : > { %3624 = vmatprep.mubr.msk.bf16.mxu1 %vm6208_vm2, %v1593_v20  ;;  %4145 = vmatprep.subr.bf16.mxu0 %v4826_v0  ;;  %vm6211_vm2 = vcmask 1040384  }
 0x3b2   : > { %vm6213_vm0 = vmmov %vm6211_vm2 }
 0x3b4   : > { %4147 = vmatpush3.bf16.msra.mxu0 %v4146_v45 }
 0x3b5   : > { %4148 = vmatprep.subr.bf16.mxu0 %v4826_v0 }
 0x3b8   : > { %3625 = vmatmul.mubr.msk.bf16.gmra.mrb[32].mxu1 %vm6209_vm7, %v1229_v58  ;;  %vm6223_vm7 = vmmov %vm6220_vm5 }
 0x43d   : > { %v1410_v15 = vpop.f32.mrb[4].mxu1 }
 0x43e   : > { %v1412_v43 = vpop.f32.mrb[5].mxu1 }
 0x43f   : > { %v1413_v50 = vpop.f32.mrb[6].mxu1  ;;  %v1558_v51 = vpop.f32.mrb[4].mxu0 }
 0x440   : > { %v1559_v52 = vadd.f32 %v1558_v51, %v1410_v15  ;;  %v1415_v5 = vpop.f32.mrb[7].mxu1  ;;  %v1560_v22 = vpop.f32.mrb[5].mxu0 }
 0x441   : > { %v1561_v19 = vpop.f32.mrb[6].mxu0 }
 0x442   : > { %v1562_v24 = vadd.f32 %v1561_v19, %v1413_v50  ;;  %v1563_v46 = vpop.f32.mrb[7].mxu0 }
 0x45b   : > { %v1418_v49 = vpop.f32.mrb[8].mxu1 }
 0x45c   : > { %v1420_v9 = vpop.f32.mrb[9].mxu1 }
 0x45d   : > { %v1421_v54 = vpop.f32.mrb[10].mxu1 }
 0x45e   : > { %v1423_v12 = vpop.f32.mrb[11].mxu1  ;;  %v1566_v53 = vpop.f32.mrb[8].mxu0 }
 0x45f   : > { %v1567_v13 = vadd.f32 %v1566_v53, %v1418_v49  ;;  %v1568_v55 = vpop.f32.mrb[9].mxu0 }
 0x460   : > { %v1569_v57 = vpop.f32.mrb[10].mxu0 }
 0x461   : > { %v1570_v25 = vadd.f32 %v1569_v57, %v1421_v54  ;;  %v1571_v18 = vpop.f32.mrb[11].mxu0 }
 0x463   : > { %v1426_v14 = vpop.f32.mrb[12].mxu1 }
 0x464   : > { %v1428_v58 = vpop.f32.mrb[13].mxu1 }
 0x465   : > { %v1429_v59 = vpop.f32.mrb[14].mxu1 }
 0x466   : > { %v1431_v60 = vpop.f32.mrb[15].mxu1  ;;  %v1574_v20 = vpop.f32.mrb[12].mxu0 }
 0x467   : > { %v1575_v28 = vadd.f32 %v1574_v20, %v1426_v14  ;;  %v1576_v61 = vpop.f32.mrb[13].mxu0 }
 0x468   : > { %v1577_v62 = vpop.f32.mrb[14].mxu0 }
 0x469   : > { %v1578_v63 = vadd.f32 %v1577_v62, %v1429_v59  ;;  %v1579_v2 = vpop.f32.mrb[15].mxu0 }
 0x46b   : > { %v1434_v3 = vpop.f32.mrb[16].mxu1 }
 0x46c   : > { %v1436_v6 = vpop.f32.mrb[17].mxu1 }
 0x46d   : > { %v1437_v10 = vpop.f32.mrb[18].mxu1 }
 0x46e   : > { %v1439_v16 = vpop.f32.mrb[19].mxu1  ;;  %v1582_v39 = vpop.f32.mrb[16].mxu0 }
 0x46f   : > { %v1583_v11 = vadd.f32 %v1582_v39, %v1434_v3  ;;  %v1584_v21 = vpop.f32.mrb[17].mxu0 }
 0x470   : > { %v1585_v30 = vpop.f32.mrb[18].mxu0 }
 0x471   : > { %v1586_v31 = vadd.f32 %v1585_v30, %v1437_v10  ;;  %v1587_v32 = vpop.f32.mrb[19].mxu0 }
 0x473   : > { %v1727_v35 = vpop.f32.mrb[20].mxu1 }
 0x474   : > { %v1758_v34 = vadd.f32 %v1727_v35, %v1559_v52  ;;  %v1729_v36 = vpop.f32.mrb[21].mxu1 }
 0x475   : > { %v1730_v37 = vpop.f32.mrb[22].mxu1 }
 0x476   : > { %v1759_v40 = vadd.f32 %v1730_v37, %v1562_v24  ;;  %v1732_v41 = vpop.f32.mrb[23].mxu1  ;;  %v5799_v51 = vadd.f32 %v3626_v42, %v1758_v34 }
 0x478   : > { %v5797_v45 = vadd.f32 %v3626_v42, %v1759_v40  ;;  %v1815_v24 = vmul.f32 %v5799_v51, %v5799_v51 }
 0x47a   : > { %v1816_v52 = vmul.f32 %v5797_v45, %v5797_v45  ;;  %v1802_v46 = vadd.f32 %v5797_v45, %v5799_v51 }
 0x47b   : > { %v1735_v8 = vpop.f32.mrb[24].mxu1 }
 0x47c   : > { %v1760_v15 = vadd.f32 %v1735_v8, %v1567_v13  ;;  %v1737_v43 = vpop.f32.mrb[25].mxu1  ;;  %v1823_v12 = vadd.f32 %v1816_v52, %v1815_v24 }
 0x47d   : > { %v1738_v50 = vpop.f32.mrb[26].mxu1 }
 0x47e   : > { %v5801_v5 = vadd.f32 %v3626_v42, %v1760_v15  ;;  %v1761_v22 = vadd.f32 %v1738_v50, %v1570_v25  ;;  %v1740_v19 = vpop.f32.mrb[27].mxu1 }
 0x480   : > { %v1817_v49 = vmul.f32 %v5801_v5, %v5801_v5  ;;  %v5811_v9 = vadd.f32 %v3626_v42, %v1761_v22  ;;  %v1803_v53 = vadd.f32 %v1802_v46, %v5801_v5 }
 0x482   : > { %v1824_v25 = vadd.f32 %v1823_v12, %v1817_v49  ;;  %v1818_v18 = vmul.f32 %v5811_v9, %v5811_v9  ;;  %v1804_v60 = vadd.f32 %v1803_v53, %v5811_v9  ;;  %v1796_v53 = vld [vmem:[%s6212_s28] sm:$0xff] }
 0x483   : > { %v1743_v54 = vpop.f32.mrb[28].mxu1 }
 0x484   : > { %v1762_v13 = vadd.f32 %v1743_v54, %v1575_v28  ;;  %v1745_v55 = vpop.f32.mrb[29].mxu1  ;;  %v1825_v62 = vadd.f32 %v1824_v25, %v1818_v18 }
 0x485   : > { %v1746_v57 = vpop.f32.mrb[30].mxu1 }
 0x486   : > { %v5816_v14 = vadd.f32 %v3626_v42, %v1762_v13  ;;  %v1763_v58 = vadd.f32 %v1746_v57, %v1578_v63  ;;  %v1748_v59 = vpop.f32.mrb[31].mxu1  ;;  %v1797_v13 = vld [vmem:[%s6212_s28 + $0x8] sm:$0xff]  ;;  %v1798_v57 = vld [vmem:[%s6212_s28 + $0x10] sm:$0xff] }
 0x487   : > { %v4149_v55 = vpack.c.bf16 %v1797_v13, %v1796_v53 }
 0x488   : > { %v1819_v20 = vmul.f32 %v5816_v14, %v5816_v14  ;;  %v5821_v61 = vadd.f32 %v3626_v42, %v1763_v58  ;;  %v1805_v28 = vadd.f32 %v1804_v60, %v5816_v14 }
 0x48a   : > { %v1826_v3 = vadd.f32 %v1825_v62, %v1819_v20  ;;  %v1820_v6 = vmul.f32 %v5821_v61, %v5821_v61  ;;  %v1806_v63 = vadd.f32 %v1805_v28, %v5821_v61 }
 0x48b   : > { %v1751_v2 = vpop.f32.mrb[32].mxu1 }
 0x48c   : > { %v1764_v10 = vadd.f32 %v1751_v2, %v1583_v11  ;;  %v1753_v16 = vpop.f32.mrb[33].mxu1  ;;  %v1827_v35 = vadd.f32 %v1826_v3, %v1820_v6  ;;  %v4385_v3 = vld [vmem:[#allocation11 + $0x100] sm:$0xff]  }
 0x48d   : > { %v1754_v39 = vpop.f32.mrb[34].mxu1  ;;  %v4386_v6 = vld [vmem:[#allocation11 + $0xc0] sm:$0xff]   ;;  %v4388_v16 = vld [vmem:[#allocation11 + $0x108] sm:$0xff]  }
 0x48e   : > { %v5827_v21 = vadd.f32 %v3626_v42, %v1764_v10  ;;  %v1765_v30 = vadd.f32 %v1754_v39, %v1586_v31  ;;  %v1756_v32 = vpop.f32.mrb[35].mxu1  ;;  %v4387_v10 = vld [vmem:[#allocation11 + $0x140] sm:$0xff]   ;;  %v4390_v39 = vld [vmem:[#allocation11 + $0x148] sm:$0xff]  }
 0x48f   : > { %4018 = vmatprep.subr.bf16.mxu1 %v4387_v10  ;;  %v4393_v32 = vld [vmem:[#allocation11 + $0x150] sm:$0xff]  }
 0x490   : > { %v1807_v34 = vadd.f32 %v1806_v63, %v5827_v21  ;;  %v1821_v36 = vmul.f32 %v5827_v21, %v5827_v21  ;;  %v5832_v37 = vadd.f32 %v3626_v42, %v1765_v30  ;;  %4019 = vmatpush3.bf16.msra.mxu1 %v4387_v10  ;;  %v4389_v63 = vld [vmem:[#allocation11 + $0xc8] sm:$0xff]   ;;  %v4391_v30 = vld [vmem:[#allocation11 + $0x110] sm:$0xff]  }
 0x491   : > { %4020 = vmatprep.subr.bf16.mxu1 %v4390_v39 }
 0x492   : > { %v1828_v40 = vadd.f32 %v1827_v35, %v1821_v36  ;;  %v1808_v41 = vadd.f32 %v1807_v34, %v5832_v37  ;;  %v1822_v11 = vmul.f32 %v5832_v37, %v5832_v37  ;;  %v4392_v35 = vld [vmem:[#allocation11 + $0xd0] sm:$0xff]   ;;  %v4394_v34 = vld [vmem:[#allocation11 + $0x118] sm:$0xff]  }
 0x493   : > { %v4396_v36 = vld [vmem:[#allocation11 + $0x158] sm:$0xff]  }
 0x494   : > { %v1809_v8 = vrot.slane %v1808_v41, 4  ;;  %v1829_v15 = vadd.f32 %v1828_v40, %v1822_v11  ;;  %4021 = vmatpush3.bf16.msra.mxu1 %v4390_v39  ;;  %v4395_v40 = vld [vmem:[#allocation11 + $0xd8] sm:$0xff]   ;;  %v4399_v11 = vld [vmem:[#allocation11 + $0x160] sm:$0xff]  }
 0x495   : > { %4022 = vmatprep.subr.bf16.mxu1 %v4393_v32 }
 0x496   : > { %v1810_v43 = vadd.f32 %v1809_v8, %v1808_v41  ;;  %v1830_v50 = vrot.slane %v1829_v15, 4  ;;  %v4397_v41 = vld [vmem:[#allocation11 + $0x120] sm:$0xff]  }
 0x497   : > { %v4398_v8 = vld [vmem:[#allocation11 + $0xe0] sm:$0xff]  }
 0x498   : > { %v1811_v31 = vrot.slane %v1810_v43, 2  ;;  %v1831_v22 = vadd.f32 %v1830_v50, %v1829_v15  ;;  %4023 = vmatpush3.bf16.msra.mxu1 %v4393_v32  ;;  %v4400_v15 = vld [vmem:[#allocation11 + $0x128] sm:$0xff]  }
 0x499   : > { %4024 = vmatprep.subr.bf16.mxu1 %v4396_v36  ;;  %v4401_v50 = vld [vmem:[#allocation11 + $0xe8] sm:$0xff]  }
 0x49a   : > { %v1812_v19 = vadd.f32 %v1811_v31, %v1810_v43  ;;  %v1832_v52 = vrot.slane %v1831_v22, 2  ;;  %v4402_v43 = vld [vmem:[#allocation11 + $0x168] sm:$0xff]   ;;  %v4403_v31 = vld [vmem:[#allocation11 + $0x130] sm:$0xff]  }
 0x49c   : > { %v1813_v24 = vrot.slane %v1812_v19, 1  ;;  %v1833_v46 = vadd.f32 %v1832_v52, %v1831_v22  ;;  %4025 = vmatpush3.bf16.msra.mxu1 %v4396_v36  ;;  %v4405_v22 = vld [vmem:[#allocation11 + $0x170] sm:$0xff]   ;;  %v4406_v52 = vld [vmem:[#allocation11 + $0x138] sm:$0xff]  }
 0x49d   : > { %4026 = vmatprep.subr.bf16.mxu1 %v4399_v11 }
 0x49e   : > { %v1834_v49 = vrot.slane %v1833_v46, 1  ;;  %v1814_v54 = vadd.f32 %v1813_v24, %v1812_v19  ;;  %v4404_v19 = vld [vmem:[#allocation11 + $0xf0] sm:$0xff]   ;;  %v4407_v24 = vld [vmem:[#allocation11 + $0xf8] sm:$0xff]  }
 0x4a0   : > { %v1835_v42 = vadd.f32 %v1834_v49, %v1833_v46  ;;  %4027 = vmatpush3.bf16.msra.mxu1 %v4399_v11  ;;  %v4408_v46 = vld [vmem:[#allocation11 + $0x178] sm:$0xff]   ;;  %v4409_v49 = vld [vmem:[#allocation11 + $0x40] sm:$0xff]  }
 0x4a1   : > { %4028 = vmatprep.subr.bf16.mxu1 %v4402_v43 }
 0x4a2   : > { %v1836_v12 = vsel %vm6211_vm2, %v1814_v54, %v1835_v42  ;;  %v5855_v54 = vld [vmem:[#allocation11 + $0x80] sm:$0xff]   ;;  %vm6224_vm2 = vnez %v6199_v17  ;;  %v4453_v17 = vld [vmem:[#allocation11 + $0x230] sm:$0xff]  }
 0x4a3   : > { %4005 = vmatmul.mubr.f32.vlgmr.msra.gmra.mrb[2].mxu0 %v1836_v12 }
 0x4a4   : > { %4015 = vmatprep.mubr.msk.f32.mxu0 %vm6204_vm4, %v4828_v1  ;;  %4150 = vmatpush3.bf16.msra.mxu0 %v4149_v55  ;;  %v1799_v1 = vld [vmem:[%s6212_s28 + $0x18] sm:$0xff]  ;;  %vm6214_vm4 = vcmask 261120   ;;  %v1800_v55 = vld [vmem:[%s6215_s8] sm:$0x1]  ;;  %s6029_s8 = scalar_lea.vmem [#allocation14], %s3501_s15 }
 0x4a5   : > { %4151 = vmatprep.subr.bf16.mxu0 %v4826_v0  ;;  %v4152_v25 = vpack.c.bf16 %v1799_v1, %v1798_v57  ;;  %4029 = vmatpush3.bf16.msra.mxu1 %v4402_v43  ;;  %s3358_s15 = sshll.u32 %s6029_s8, 4  ;;  %s6038_s15 = int_to_ptr.vmem [resolvable:$true] %s3358_s15 }
 0x4a6   : > { %4030 = vmatprep.subr.bf16.mxu1 %v4405_v22  ;;  %s4735_s27 = scalar_lea.vmem %s6038_s15, 1024  ;;  %p4742_p1 = scmp.lt.s32.totalorder %s6038_s15, %s4740_s19 }
 0x4a7   : > { %p4736_p6 = scmp.ne.s32.totalorder %s6038_s15, %s4735_s27 }
 0x4a8   : > { %4153 = vmatpush3.bf16.msra.mxu0 %v4152_v25  ;;  %v1801_v25 = vld [vmem:[%s6216_s20] sm:$0x1] }
 0x4a9   : > { %3778 = vmatprep.subr.bf16.mxu0 %v4385_v3  ;;  %4031 = vmatpush3.bf16.msra.mxu1 %v4405_v22  ;;  %p4737_p12 = pnand %p4736_p6, %p6244_p9 }
 0x4aa   : > { %4032 = vmatprep.subr.bf16.mxu1 %v4408_v46 }
 0x4ab   : > { %p4738_p13 = pneg %p4737_p12 }
 0x4ad   : > { %4033 = vmatpush3.bf16.msra.mxu1 %v4408_v46 }
 0x4ae   : > { %4042 = vmatprep.subr.bf16.mxu1 %v5855_v54 }
 0x576   : > { %v1903_v18 = vpop.f32.mrb[2].mxu0 }
 0x577   : > { %v1907_v58 = vmul.f32 0.00390625, %v1903_v18  ;;  %v4006_v59 = vpop.f32.mrb[3].mxu0 }
 0x579   : > { %v1908_v60 = vmul.f32 %v1907_v58, %v1907_v58 }
 0x57b   : > { %v1910_v20 = vrot.slane %v1908_v60, 7 }
 0x57d   : > { %v1912_v62 = vsub.f32 %v1907_v58, %v1910_v20 }
 0x57f   : > { %v1913_v28 = vadd.f32 1e-05, %v1912_v62 }
 0x581   : > { %4495 = vrsqrt.f32 %v1913_v28 }
 0x58b   : > { %v4496_v2 = vpop.eup %4495 }
 0x58c   : > { %v1915_v0 = vsel %vm6213_vm0, %v1907_v58, %v4496_v2 }
 0x58d   : > { %4016 = vmatmul.mubr.msk.f32.vlgmr.msra.gmra.mrb[20].mxu0 %vm6214_vm4, %v1915_v0 }
 0x58e   : > { %3779 = vmatpush3.bf16.msra.mxu0 %v4386_v6 }
 0x58f   : > { %3780 = vmatprep.subr.bf16.mxu0 %v4388_v16 }
 0x592   : > { %3781 = vmatpush3.bf16.msra.mxu0 %v4389_v63 }
 0x593   : > { %3782 = vmatprep.subr.bf16.mxu0 %v4391_v30 }
 0x596   : > { %3783 = vmatpush3.bf16.msra.mxu0 %v4392_v35 }
 0x597   : > { %3784 = vmatprep.subr.bf16.mxu0 %v4394_v34 }
 0x59a   : > { %3785 = vmatpush3.bf16.msra.mxu0 %v4395_v40 }
 0x59b   : > { %3786 = vmatprep.subr.bf16.mxu0 %v4397_v41 }
 0x59e   : > { %3787 = vmatpush3.bf16.msra.mxu0 %v4398_v8 }
 0x59f   : > { %3788 = vmatprep.subr.bf16.mxu0 %v4400_v15 }
 0x5a2   : > { %3789 = vmatpush3.bf16.msra.mxu0 %v4401_v50 }
 0x5a3   : > { %3790 = vmatprep.subr.bf16.mxu0 %v4403_v31 }
 0x5a6   : > { %3791 = vmatpush3.bf16.msra.mxu0 %v4404_v19 }
 0x5a7   : > { %3792 = vmatprep.subr.bf16.mxu0 %v4406_v52 }
 0x5aa   : > { %3793 = vmatpush3.bf16.msra.mxu0 %v4407_v24 }
 0x5ab   : > { %3830 = vmatprep.subr.bf16.mxu0 %v4409_v49 }
 0x660   : > { %v1985_v42 = vpop.f32.mrb[20].mxu0 }
 0x661   : > { %v1996_v12 = vrot.slane %v1985_v42, %v5451_v23  ;;  %v4017_v53 = vpop.f32.mrb[21].mxu0 }
 0x663   : > { %v1997_v13 = vcombine.high %v1996_v12, %v1996_v12 }
 0x665   : > { %v2004_v57 = vrot.slane %v1997_v13, %v5451_v23 }
 0x667   : > { %v2006_v1 = vmul.f32 %v2004_v57, %v1800_v55 }
 0x669   : > { %v2007_v18 = vmul.f32 %v2006_v1, %v1985_v42  ;;  %v2013_v58 = vrot.slane %v2006_v1, %v5455_v33 }
 0x66b   : > { %v2008_v59 = vsub.f32 %v1801_v25, %v2007_v18  ;;  %v2015_v60 = vmul.f32 %v2013_v58, %v5799_v51  ;;  %v2016_v62 = vmul.f32 %v2013_v58, %v5797_v45  ;;  %v2017_v28 = vmul.f32 %v2013_v58, %v5801_v5 }
 0x66c   : > { %v2018_v2 = vmul.f32 %v2013_v58, %v5811_v9  ;;  %v2019_v23 = vmul.f32 %v2013_v58, %v5816_v14  ;;  %v2020_v0 = vmul.f32 %v2013_v58, %v5821_v61  ;;  %v2021_v3 = vmul.f32 %v2013_v58, %v5827_v21 }
 0x66d   : > { %v2027_v20 = vrot.slane %v2008_v59, %v5455_v33  ;;  %v2022_v33 = vmul.f32 %v2013_v58, %v5832_v37 }
 0x66f   : > { %v2029_v6 = vadd.f32 %v2027_v20, %v2015_v60  ;;  %v2030_v10 = vadd.f32 %v2027_v20, %v2016_v62  ;;  %v2031_v16 = vadd.f32 %v2027_v20, %v2017_v28  ;;  %v2032_v39 = vadd.f32 %v2027_v20, %v2018_v2 }
 0x670   : > { %v2033_v63 = vadd.f32 %v2027_v20, %v2019_v23  ;;  %v2034_v51 = vadd.f32 %v2027_v20, %v2020_v0  ;;  %v2035_v5 = vadd.f32 %v2027_v20, %v2021_v3  ;;  %v2036_v9 = vadd.f32 %v2027_v20, %v2022_v33 }
 0x671   : > { %v3628_v30 = vmul.f32 -1.442695, %v2029_v6  ;;  %v3629_v45 = vmul.f32 -1.442695, %v2030_v10  ;;  %v3630_v32 = vmul.f32 -1.442695, %v2031_v16 }
 0x672   : > { %v3631_v35 = vmul.f32 -1.442695, %v2032_v39  ;;  %v3632_v14 = vmul.f32 -1.442695, %v2033_v63  ;;  %v3633_v61 = vmul.f32 -1.442695, %v2034_v51 }
 0x673   : > { %4497 = vpow2.f32 %v3628_v30  ;;  %v3634_v21 = vmul.f32 -1.442695, %v2035_v5  ;;  %v3635_v34 = vmul.f32 -1.442695, %v2036_v9 }
 0x674   : > { %4499 = vpow2.f32 %v3629_v45 }
 0x675   : > { %4501 = vpow2.f32 %v3630_v32 }
 0x676   : > { %4503 = vpow2.f32 %v3631_v35  ;;  %v4410_v35 = vld [vmem:[#allocation11] sm:$0xff]  }
 0x677   : > { %4505 = vpow2.f32 %v3632_v14 }
 0x678   : > { %4507 = vpow2.f32 %v3633_v61 }
 0x679   : > { %4509 = vpow2.f32 %v3634_v21 }
 0x67a   : > { %4511 = vpow2.f32 %v3635_v34 }
 0x67d   : > { %v4498_v36 = vpop.eup %4497 }
 0x67e   : > { %v4500_v37 = vpop.eup %4499  ;;  %v2061_v40 = vadd.f32 1.0, %v4498_v36 }
 0x67f   : > { %v4502_v41 = vpop.eup %4501  ;;  %v2062_v11 = vadd.f32 1.0, %v4500_v37 }
 0x680   : > { %v4504_v8 = vpop.eup %4503  ;;  %4513 = vrcp.f32 %v2061_v40  ;;  %v2063_v15 = vadd.f32 1.0, %v4502_v41 }
 0x681   : > { %v4506_v43 = vpop.eup %4505  ;;  %4515 = vrcp.f32 %v2062_v11  ;;  %v2064_v50 = vadd.f32 1.0, %v4504_v8 }
 0x682   : > { %v4508_v31 = vpop.eup %4507  ;;  %4517 = vrcp.f32 %v2063_v15  ;;  %v2065_v22 = vadd.f32 1.0, %v4506_v43  ;;  %v4414_v15 = vld [vmem:[#allocation11 + $0x88] sm:$0xff]   ;;  %v4415_v43 = vld [vmem:[#allocation11 + $0x50] sm:$0xff]  }
 0x683   : > { %v4510_v19 = vpop.eup %4509  ;;  %4519 = vrcp.f32 %v2064_v50  ;;  %v2066_v52 = vadd.f32 1.0, %v4508_v31 }
 0x684   : > { %v4512_v24 = vpop.eup %4511  ;;  %4521 = vrcp.f32 %v2065_v22  ;;  %v2067_v46 = vadd.f32 1.0, %v4510_v19  ;;  %v4416_v19 = vld [vmem:[#allocation11 + $0x10] sm:$0xff]  }
 0x685   : > { %4523 = vrcp.f32 %v2066_v52  ;;  %v2068_v49 = vadd.f32 1.0, %v4512_v24  ;;  %v4417_v52 = vld [vmem:[#allocation11 + $0x90] sm:$0xff]  }
 0x686   : > { %4525 = vrcp.f32 %v2067_v46  ;;  %v4418_v46 = vld [vmem:[#allocation11 + $0x58] sm:$0xff]  }
 0x687   : > { %4527 = vrcp.f32 %v2068_v49 }
 0x68a   : > { %v4514_v42 = vpop.eup %4513 }
 0x68b   : > { %v4516_v12 = vpop.eup %4515  ;;  %v2085_v53 = vmul.f32 %v4514_v42, %v2029_v6 }
 0x68c   : > { %v4518_v13 = vpop.eup %4517  ;;  %v2086_v55 = vmul.f32 %v4516_v12, %v2030_v10  ;;  %v4419_v12 = vld [vmem:[#allocation11 + $0x18] sm:$0xff]  }
 0x68d   : > { %v4520_v57 = vpop.eup %4519  ;;  %v2087_v1 = vmul.f32 %v4518_v13, %v2031_v16 }
 0x68e   : > { %v4522_v25 = vpop.eup %4521  ;;  %v5876_v18 = vpack.c.bf16 %v2086_v55, %v2085_v53  ;;  %v2088_v58 = vmul.f32 %v4520_v57, %v2032_v39  ;;  %v4420_v53 = vld [vmem:[#allocation11 + $0x98] sm:$0xff]   ;;  %v4421_v55 = vld [vmem:[#allocation11 + $0x60] sm:$0xff]  }
 0x68f   : > { %v4524_v59 = vpop.eup %4523  ;;  %v2089_v60 = vmul.f32 %v4522_v25, %v2033_v63  ;;  %v4423_v25 = vld [vmem:[#allocation11 + $0xa0] sm:$0xff]  }
 0x690   : > { %v4526_v20 = vpop.eup %4525  ;;  %2482 = vmatprep.mubr.bf16.mxu0 %v5876_v18  ;;  %v2099_v62 = vshrl.u32 %v5876_v18, 16  ;;  %v2102_v28 = vshll.u32 %v5876_v18, 16  ;;  %v5881_v2 = vpack.c.bf16 %v2088_v58, %v2087_v1  ;;  %v2090_v23 = vmul.f32 %v4524_v59, %v2034_v51  ;;  %v4412_v51 = vld [vmem:[#allocation11 + $0x48] sm:$0xff]   ;;  %v4422_v1 = vld [vmem:[#allocation11 + $0x20] sm:$0xff]  }
 0x691   : > { %v4528_v0 = vpop.eup %4527  ;;  %v2091_v3 = vmul.f32 %v4526_v20, %v2035_v5  ;;  %v4426_v20 = vld [vmem:[#allocation11 + $0xa8] sm:$0xff]  }
 0x692   : > { %v2101_v6 = vrot.slane %v2099_v62, 7  ;;  %v2106_v10 = vshrl.u32 %v5881_v2, 16  ;;  %v2109_v16 = vshll.u32 %v5881_v2, 16  ;;  %v2138_v39 = vrot.slane %v2102_v28, 1 }
 0x693   : > { %v5885_v33 = vpack.c.bf16 %v2090_v23, %v2089_v60  ;;  %v2092_v63 = vmul.f32 %v4528_v0, %v2036_v9  ;;  %v4425_v60 = vld [vmem:[#allocation11 + $0x28] sm:$0xff]   ;;  %v4428_v23 = vld [vmem:[#allocation11 + $0x30] sm:$0xff]  }
 0x694   : > { %v2104_v30 = vor.u32 %v2102_v28, %v2101_v6  ;;  %v2139_v45 = vor.u32 %v2138_v39, %v2099_v62  ;;  %v2140_v32 = vrot.slane %v2109_v16, 1  ;;  %v2108_v36 = vrot.slane %v2106_v10, 7  ;;  %v4427_v62 = vld [vmem:[#allocation11 + $0x70] sm:$0xff]   ;;  %v4432_v39 = vld [vmem:[#allocation11 + $0xb8] sm:$0xff]  }
 0x695   : > { %v2117_v14 = vshll.u32 %v5885_v33, 16  ;;  %v5888_v61 = vpack.c.bf16 %v2092_v63, %v2091_v3  ;;  %v2114_v37 = vshrl.u32 %v5885_v33, 16  ;;  %v4429_v0 = vld [vmem:[#allocation11 + $0xb0] sm:$0xff]   ;;  %v4430_v3 = vld [vmem:[#allocation11 + $0x78] sm:$0xff]   ;;  %v4433_v63 = vld [vmem:[#allocation11 + $0x1c0] sm:$0xff]  }
 0x696   : > { %v5892_v5 = vsel %vm5551_vm12, 0, %v2104_v30  ;;  %v2141_v21 = vsel %vm6217_vm14, %v2139_v45, %v2140_v32  ;;  %v2142_v34 = vor.u32 %v2140_v32, %v2106_v10  ;;  %vm6218_vm12 = vmmov %vm6217_vm14  ;;  %v2111_v50 = vor.u32 %v2109_v16, %v2108_v36  ;;  %v4431_v16 = vld [vmem:[#allocation11 + $0x38] sm:$0xff]   ;;  %v4434_v32 = vld [vmem:[#allocation11 + $0x180] sm:$0xff]  }
 0x697   : > { %3660 = vmatmul.mubr.msk.bf16.vlgmr.msra.gmra.mrb[24].mxu0 %vm5555_vm13, %v5892_v5  ;;  %4034 = vmatprep.mubr.msk.bf16.mxu1 %vm5505_vm3, %v2141_v21  ;;  %v2143_v9 = vrot.slane %v2117_v14, 1  ;;  %v2125_v40 = vshll.u32 %v5888_v61, 16  ;;  %vm6219_vm1 = vmmov %vm6218_vm12  ;;  %v2122_v22 = vshrl.u32 %v5888_v61, 16  ;;  %v2154_v49 = vsel %vm5505_vm3, %v2141_v21, 0 }
 0x698   : > { %3831 = vmatpush3.bf16.msra.mxu0 %v4410_v35  ;;  %2490 = vmatprep.mubr.bf16.mxu0 %v5881_v2  ;;  %v2116_v42 = vrot.slane %v2114_v37, 7  ;;  %v5925_v13 = vrot.slane %v2154_v49, 4  ;;  %vm6221_vm3 = vnez %v6166_v48  ;;  %v2171_v10 = vrot.slane %v5876_v18, 4  ;;  %v4435_v35 = vld [vmem:[#allocation11 + $0x200] sm:$0xff]  }
 0x699   : > { %v5904_v41 = vsel %vm6218_vm12, %v2142_v34, %v2143_v9  ;;  %v2145_v11 = vor.u32 %v2143_v9, %v2114_v37  ;;  %v2146_v8 = vrot.slane %v2125_v40, 1  ;;  %3832 = vmatprep.subr.bf16.mxu0 %v4412_v51  ;;  %v2124_v58 = vrot.slane %v2122_v22, 7  ;;  %v4437_v34 = vld [vmem:[#allocation11 + $0x188] sm:$0xff]   ;;  %v4439_v9 = vld [vmem:[#allocation11 + $0x1d0] sm:$0xff]  }
 0x69a   : > { %4035 = vmatmul.mubr.msk.bf16.vlgmr.msra.gmra.mrb[36].mxu1 %vm5658_vm15, %v5904_v41  ;;  %v2119_v57 = vor.u32 %v2117_v14, %v2116_v42  ;;  %v2134_v30 = vsel %vm5555_vm13, %v5892_v5, 0  ;;  %v2155_v45 = vsel %vm5658_vm15, %v5904_v41, 0  ;;  %v2175_v14 = vrot.slane %v5881_v2, 4  ;;  %v4438_v2 = vld [vmem:[#allocation11 + $0x208] sm:$0xff]  }
 0x69b   : > { %4043 = vmatpush3.bf16.msra.mxu1 %v5855_v54  ;;  %v5911_v31 = vsel %vm6219_vm1, %v2145_v11, %v2146_v8  ;;  %v2148_v24 = vor.u32 %v2146_v8, %v2122_v22  ;;  %v5920_v54 = vsel %vm6220_vm5, %v2101_v6, %v2111_v50  ;;  %v2127_v28 = vor.u32 %v2125_v40, %v2124_v58  ;;  %v4440_v40 = vld [vmem:[#allocation11 + $0x190] sm:$0xff]   ;;  %v4442_v8 = vld [vmem:[#allocation11 + $0x1d8] sm:$0xff]   ;;  %v4445_v22 = vld [vmem:[#allocation11 + $0x1e0] sm:$0xff]  }
 0x69c   : > { %4038 = vmatprep.mubr.msk.bf16.mxu1 %vm5680_vm10, %v5911_v31  ;;  %3833 = vmatpush3.bf16.msra.mxu0 %v4413_v27  ;;  %v2156_v18 = vsel %vm5680_vm10, %v5911_v31, 0  ;;  %v2170_v51 = vrot.slane %v2134_v30, 4  ;;  %v2177_v21 = vrot.slane %v2155_v45, 4  ;;  %v2135_v29 = vsel %vm5644_vm9, %v5920_v54, 0  ;;  %v4441_v27 = vld [vmem:[#allocation11 + $0x210] sm:$0xff]   ;;  %v4443_v50 = vld [vmem:[#allocation11 + $0x198] sm:$0xff]  }
 0x69d   : > { %4044 = vmatprep.subr.bf16.mxu1 %v4414_v15  ;;  %3834 = vmatprep.subr.bf16.mxu0 %v4415_v43  ;;  %v5930_v56 = vsel %vm5636_vm6, %v2148_v24, 0  ;;  %vm6222_vm6 = vmmov %vm6220_vm5  ;;  %v5946_v6 = vsel %vm6223_vm7, %v2116_v42, %v2127_v28  ;;  %v2183_v5 = vrot.slane %v2156_v18, 4  ;;  %vm6225_vm13 = vcmask 1043456   ;;  %v4444_v31 = vld [vmem:[#allocation11 + $0x218] sm:$0xff]   ;;  %v4457_v58 = vld [vmem:[#allocation13] sm:$0xff]  }
 0x69e   : > { %v5939_v59 = vsel %vm6222_vm6, %v2108_v36, %v2119_v57  ;;  %v5970_v44 = vsel %vm6225_vm13, %v2171_v10, %v2175_v14  ;;  %vm6226_vm15 = vmmov %vm6225_vm13  ;;  %v2173_v47 = vrot.slane %v2135_v29, 4  ;;  %v2157_v48 = vsel %vm5654_vm11, %v5930_v56, 0  ;;  %v4454_v57 = vld [vmem:[#allocation11 + $0x1f8] sm:$0xff]  }
 0x69f   : > { %4045 = vmatpush3.bf16.msra.mxu1 %v4414_v15  ;;  %3661 = vmatmul.mubr.msk.bf16.gmra.mrb[28].mxu0 %vm5644_vm9, %v5920_v54  ;;  %v2178_v36 = vsel %vm6226_vm15, %v5925_v13, %v2177_v21  ;;  %vm6227_vm9 = vmmov %vm6225_vm13  ;;  %v2181_v41 = vrot.slane %v5885_v33, 4  ;;  %v5983_v11 = vrot.slane %v2157_v48, 4  ;;  %v2136_v15 = vsel %vm5696_vm8, %v5939_v59, 0  ;;  %v4536_v30 = vld [vmem:[%s5195_s0 + $0x38] sm:$0xff] }
 0x6a0   : > { %3835 = vmatpush3.bf16.msra.mxu0 %v4416_v19  ;;  %4046 = vmatprep.subr.bf16.mxu1 %v4417_v52  ;;  %v5979_v37 = vsel %vm6227_vm9, %v2177_v21, %v2183_v5  ;;  %vm6228_vm10 = vmmov %vm6227_vm9  ;;  %v2179_v19 = vrot.slane %v2136_v15, 4  ;;  %v2187_v24 = vrot.slane %v5888_v61, 4  ;;  %v2137_v54 = vsel %vm6224_vm2, %v5946_v6, 0  ;;  %v3725_v15 = vld [vmem:[%s6241_s30] ss:$0 sm:$0xff]  ;;  %s3345_s30 = scalar_lea.sflag [#allocation4], %s5189_s25 }
 0x6a1   : > { %2498 = vmatprep.mubr.bf16.mxu0 %v5885_v33  ;;  %3836 = vmatprep.subr.bf16.mxu0 %v4418_v46  ;;  %v2174_v26 = vsel %vm6228_vm10, %v2170_v51, %v2173_v47  ;;  %vm6230_vm0 = vmmov %vm6227_vm9  ;;  %v4448_v46 = vld [vmem:[#allocation11 + $0x1e8] sm:$0xff]   ;;  %vm6235_vm1 = vcmask 523264  }
 0x6a2   : > { %4039 = vmatmul.mubr.msk.bf16.gmra.mrb[40].mxu1 %vm5654_vm11, %v5930_v56  ;;  %vm6229_vm11 = vmmov %vm6227_vm9  ;;  %v2190_v33 = vsel %vm6230_vm0, %v2183_v5, %v5983_v11  ;;  %v2185_v56 = vrot.slane %v2137_v54, 4 }
 0x6a3   : > { %4047 = vmatpush3.bf16.msra.mxu1 %v4417_v52  ;;  %4058 = vmatprep.mubr.msk.bf16.mxu1 %vm6221_vm3, %v5925_v13  ;;  %v2182_v43 = vsel %vm6229_vm11, %v2175_v14, %v2181_v41  ;;  %v4447_v52 = vld [vmem:[#allocation11 + $0x220] sm:$0xff]   ;;  %vm6232_vm4 = vmmov %vm6230_vm0  ;;  %v4451_v13 = vld [vmem:[#allocation11 + $0x1f0] sm:$0xff]  }
 0x6a4   : > { %3837 = vmatpush3.bf16.msra.mxu0 %v4419_v12  ;;  %4048 = vmatprep.subr.bf16.mxu1 %v4420_v53  ;;  %v2188_v42 = vsel %vm6232_vm4, %v2181_v41, %v2187_v24  ;;  %v4449_v12 = vld [vmem:[#allocation11 + $0x1a8] sm:$0xff]   ;;  %vm6233_vm14 = vmmov %vm6230_vm0 }
 0x6a5   : > { %3838 = vmatprep.subr.bf16.mxu0 %v4421_v55  ;;  %v4452_v55 = vld [vmem:[#allocation11 + $0x1b0] sm:$0xff]   ;;  %vm6234_vm12 = vmmov %vm6230_vm0 }
 0x6a6   : > { %vm6236_vm5 = vmmov %vm6230_vm0 }
 0x6a7   : > { %4049 = vmatpush3.bf16.msra.mxu1 %v4420_v53  ;;  %3662 = vmatmul.mubr.msk.bf16.gmra.mrb[32].mxu0 %vm5696_vm8, %v5939_v59  ;;  %vm6231_vm8 = vmmov %vm6230_vm0  ;;  %v4450_v53 = vld [vmem:[#allocation11 + $0x228] sm:$0xff]  }
 0x6a8   : > { %3839 = vmatpush3.bf16.msra.mxu0 %v4422_v1  ;;  %4050 = vmatprep.subr.bf16.mxu1 %v4423_v25  ;;  %v2180_v49 = vsel %vm6231_vm8, %v2173_v47, %v2179_v19  ;;  %v2186_v1 = vsel %vm6233_vm14, %v2179_v19, %v2185_v56  ;;  %v4458_v59 = vld [vmem:[#allocation13 + $0x8] sm:$0xff]   ;;  %vm6238_vm6 = vmmov %vm6235_vm1 }
 0x6a9   : > { %2506 = vmatprep.mubr.bf16.mxu0 %v5888_v61  ;;  %3840 = vmatprep.subr.bf16.mxu0 %v4424_v4  ;;  %v4456_v4 = vld [vmem:[#allocation11 + $0x238] sm:$0xff]   ;;  %vm6239_vm7 = vmmov %vm6230_vm0 }
 0x6ab   : > { %4051 = vmatpush3.bf16.msra.mxu1 %v4423_v25  ;;  %v4455_v25 = vld [vmem:[#allocation11 + $0x1b8] sm:$0xff]  }
 0x6ac   : > { %3841 = vmatpush3.bf16.msra.mxu0 %v4425_v60  ;;  %4052 = vmatprep.subr.bf16.mxu1 %v4426_v20  ;;  %v4459_v60 = vld [vmem:[#allocation13 + $0x10] sm:$0xff]  }
 0x6ad   : > { %3842 = vmatprep.subr.bf16.mxu0 %v4427_v62  ;;  %v4530_v62 = vld [vmem:[%s5195_s0 + $0x8] sm:$0xff] }
 0x6af   : > { %4053 = vmatpush3.bf16.msra.mxu1 %v4426_v20  ;;  %3663 = vmatmul.mubr.msk.bf16.gmra.mrb[36].mxu0 %vm6224_vm2, %v5946_v6  ;;  %v4529_v20 = vld [vmem:[%s5195_s0] sm:$0xff]  ;;  %vm6240_vm2 = vmmov %vm6235_vm1 }
 0x6b0   : > { %3843 = vmatpush3.bf16.msra.mxu0 %v4428_v23  ;;  %4054 = vmatprep.subr.bf16.mxu1 %v4429_v0  ;;  %v3208_v28 = vpack.c.bf16 %v4530_v62, %v4529_v20  ;;  %v4460_v23 = vld [vmem:[#allocation13 + $0x18] sm:$0xff]  }
 0x6b1   : > { %3693 = vmatprep.mubr.msk.bf16.mxu0 %vm6221_vm3, %v2171_v10  ;;  %3844 = vmatprep.subr.bf16.mxu0 %v4430_v3  ;;  %v4532_v3 = vld [vmem:[%s5195_s0 + $0x18] sm:$0xff]  ;;  %v4533_v10 = vld [vmem:[%s5195_s0 + $0x20] sm:$0xff] }
 0x6b3   : > { %4055 = vmatpush3.bf16.msra.mxu1 %v4429_v0  ;;  %v4531_v0 = vld [vmem:[%s5195_s0 + $0x10] sm:$0xff] }
 0x6b4   : > { %3845 = vmatpush3.bf16.msra.mxu0 %v4431_v16  ;;  %4056 = vmatprep.subr.bf16.mxu1 %v4432_v39  ;;  %v3209_v6 = vpack.c.bf16 %v4532_v3, %v4531_v0  ;;  %v4534_v16 = vld [vmem:[%s5195_s0 + $0x28] sm:$0xff] }
 0x6b5   : > { %3882 = vmatprep.subr.bf16.mxu0 %v4433_v63  ;;  %v4535_v63 = vld [vmem:[%s5195_s0 + $0x30] sm:$0xff]  ;;  %s6243_s0 = sld [smem:[#allocation29_spill]] }
 0x6b6   : > { %v3211_v45 = vpack.c.bf16 %v4536_v30, %v4535_v63 }
 0x6b7   : > { %4057 = vmatpush3.bf16.msra.mxu1 %v4432_v39  ;;  %3695 = vmatmul.mubr.msk.bf16.vlgmr.msra.gmra.mrb[40].mxu0 %vm6221_vm3, %v2170_v51  ;;  %v3210_v39 = vpack.c.bf16 %v4534_v16, %v4533_v10  ;;  %vm6237_vm3 = vmmov %vm6235_vm1 }
 0x6b8   : > { %3883 = vmatpush3.bf16.msra.mxu0 %v4434_v32  ;;  %4066 = vmatprep.subr.bf16.mxu1 %v4435_v35 }
 0x6b9   : > { %2764 = vmatprep.mubr.bf16.mxu0 %v5970_v44  ;;  %3884 = vmatprep.subr.bf16.mxu0 %v4436_v38 }
 0x6ba   : > { %4059 = vmatmul.mubr.bf16.vlgmr.msra.gmra.mrb[36].mxu1 %v2178_v36 }
 0x6bb   : > { %4062 = vmatprep.mubr.bf16.mxu1 %v5979_v37  ;;  %4067 = vmatpush3.bf16.msra.mxu1 %v4435_v35  ;;  %s6044_s18 = scalar_lea.hbm %s6243_s0, %s3741_s10 }
 0x6bc   : > { %3885 = vmatpush3.bf16.msra.mxu0 %v4437_v34  ;;  %4068 = vmatprep.subr.bf16.mxu1 %v4438_v2 }
 0x6bd   : > { %3886 = vmatprep.subr.bf16.mxu0 %v4439_v9 }
 0x6bf   : > { %4069 = vmatpush3.bf16.msra.mxu1 %v4438_v2  ;;  %2765 = vmatmul.mubr.bf16.gmra.mrb[44].mxu0 %v2174_v26 }
 0x6c0   : > { %3887 = vmatpush3.bf16.msra.mxu0 %v4440_v40  ;;  %4070 = vmatprep.subr.bf16.mxu1 %v4441_v27 }
 0x6c1   : > { %2772 = vmatprep.mubr.bf16.mxu0 %v2182_v43  ;;  %3888 = vmatprep.subr.bf16.mxu0 %v4442_v8 }
 0x6c2   : > { %4063 = vmatmul.mubr.bf16.gmra.mrb[40].mxu1 %v2190_v33 }
 0x6c3   : > { %4071 = vmatpush3.bf16.msra.mxu1 %v4441_v27  ;;  %4082 = vmatprep.mubr.bf16.mxu1 %v2178_v36 }
 0x6c4   : > { %3889 = vmatpush3.bf16.msra.mxu0 %v4443_v50  ;;  %4072 = vmatprep.subr.bf16.mxu1 %v4444_v31 }
 0x6c5   : > { %3890 = vmatprep.subr.bf16.mxu0 %v4445_v22 }
 0x6c7   : > { %4073 = vmatpush3.bf16.msra.mxu1 %v4444_v31  ;;  %2773 = vmatmul.mubr.bf16.gmra.mrb[48].mxu0 %v2180_v49 }
 0x6c8   : > { %3891 = vmatpush3.bf16.msra.mxu0 %v4446_v7  ;;  %4074 = vmatprep.subr.bf16.mxu1 %v4447_v52 }
 0x6c9   : > { %2780 = vmatprep.mubr.bf16.mxu0 %v2188_v42  ;;  %3892 = vmatprep.subr.bf16.mxu0 %v4448_v46 }
 0x6cb   : > { %4075 = vmatpush3.bf16.msra.mxu1 %v4447_v52 }
 0x6cc   : > { %3893 = vmatpush3.bf16.msra.mxu0 %v4449_v12  ;;  %4076 = vmatprep.subr.bf16.mxu1 %v4450_v53 }
 0x6cd   : > { %3894 = vmatprep.subr.bf16.mxu0 %v4451_v13 }
 0x6cf   : > { %4077 = vmatpush3.bf16.msra.mxu1 %v4450_v53  ;;  %2781 = vmatmul.mubr.bf16.gmra.mrb[52].mxu0 %v2186_v1 }
 0x6d0   : > { %3895 = vmatpush3.bf16.msra.mxu0 %v4452_v55  ;;  %4078 = vmatprep.subr.bf16.mxu1 %v4453_v17 }
 0x6d1   : > { %3088 = vmatprep.mubr.bf16.mxu0 %v5970_v44  ;;  %3896 = vmatprep.subr.bf16.mxu0 %v4454_v57 }
 0x6d3   : > { %4079 = vmatpush3.bf16.msra.mxu1 %v4453_v17 }
 0x6d4   : > { %3897 = vmatpush3.bf16.msra.mxu0 %v4455_v25  ;;  %4080 = vmatprep.subr.bf16.mxu1 %v4456_v4 }
 0x6d7   : > { %4081 = vmatpush3.bf16.msra.mxu1 %v4456_v4  ;;  %3089 = vmatmul.mubr.bf16.vlgmr.msra.gmra.mrb[56].mxu0 %v2174_v26 }
 0x6d8   : > { %4090 = vmatprep.subr.bf16.mxu1 %v4457_v58  ;;  %3096 = vmatprep.mubr.bf16.mxu0 %v2182_v43 }
 0x6da   : > { %4083 = vmatmul.mubr.bf16.vlgmr.msra.gmra.mrb[36].mxu1 %v5979_v37 }
 0x6db   : > { %4086 = vmatprep.mubr.bf16.mxu1 %v2190_v33  ;;  %4091 = vmatpush3.bf16.msra.mxu1 %v4457_v58 }
 0x6dc   : > { %4092 = vmatprep.subr.bf16.mxu1 %v4458_v59 }
 0x6df   : > { %4093 = vmatpush3.bf16.msra.mxu1 %v4458_v59  ;;  %3097 = vmatmul.mubr.bf16.gmra.mrb[60].mxu0 %v2180_v49 }
 0x6e0   : > { %4094 = vmatprep.subr.bf16.mxu1 %v4459_v60  ;;  %3104 = vmatprep.mubr.bf16.mxu0 %v2188_v42 }
 0x6e2   : > { %4087 = vmatmul.mubr.msk.bf16.gmra.mrb[40].mxu1 %vm6234_vm12, %v5983_v11 }
 0x6e3   : > { %4095 = vmatpush3.bf16.msra.mxu1 %v4459_v60  ;;  %4098 = vmatprep.mubr.msk.bf16.mxu1 %vm6235_vm1, %v3208_v28 }
 0x6e4   : > { %4096 = vmatprep.subr.bf16.mxu1 %v4460_v23 }
 0x6e7   : > { %4097 = vmatpush3.bf16.msra.mxu1 %v4460_v23  ;;  %3105 = vmatmul.mubr.bf16.gmra.mrb[64].mxu0 %v2186_v1 }
 0x6e8   : > { %3722 = vmatprep.mubr.msk.bf16.mxu0 %vm6236_vm5, %v2187_v24 }
 0x6ea   : > { %4099 = vmatmul.mubr.msk.bf16.vlgmr.msra.gmra.mrb[36].mxu1 %vm6237_vm3, %v3209_v6 }
 0x6eb   : > { %4102 = vmatprep.mubr.msk.bf16.mxu1 %vm6238_vm6, %v3210_v39 }
 0x6ef   : > { %3723 = vmatmul.mubr.msk.bf16.gmra.mrb[68].mxu0 %vm6239_vm7, %v2185_v56 }
 0x6f2   : > { %4103 = vmatmul.mubr.msk.bf16.gmra.mrb[40].mxu1 %vm6240_vm2, %v3211_v45 }
 0x76a   : > { %v3794_v18 = vpop.f32.mrb[24].mxu0 }
 0x76b   : > { %v3795_v32 = vpop.f32.mrb[25].mxu0 }
 0x76c   : > { %v3796_v35 = vadd.f32 %v3795_v32, %v3794_v18  ;;  %v3797_v14 = vpop.f32.mrb[26].mxu0 }
 0x76d   : > { %v3798_v51 = vpop.f32.mrb[27].mxu0 }
 0x76e   : > { %v3799_v21 = vadd.f32 %v3798_v51, %v3797_v14  ;;  %v4159_v31 = vadd.f32 %v3796_v35, %v3725_v15 }
 0x770   : > { %v4169_v7 = vadd.f32 %v3799_v21, %v3725_v15 }
 0x772   : > { %v3800_v61 = vpop.f32.mrb[28].mxu0 }
 0x773   : > { %v3801_v38 = vpop.f32.mrb[29].mxu0 }
 0x774   : > { %v3802_v5 = vadd.f32 %v3801_v38, %v3800_v61  ;;  %v3803_v29 = vpop.f32.mrb[30].mxu0 }
 0x775   : > { %v3804_v44 = vpop.f32.mrb[31].mxu0 }
 0x776   : > { %v3805_v34 = vadd.f32 %v3804_v44, %v3803_v29  ;;  %v4154_v42 = vadd.f32 %v3802_v5, %v3725_v15 }
 0x778   : > { %v4164_v56 = vadd.f32 %v3805_v34, %v3725_v15 }
 0x77a   : > { %v3806_v2 = vpop.f32.mrb[32].mxu0 }
 0x77b   : > { %v3807_v36 = vpop.f32.mrb[33].mxu0 }
 0x77c   : > { %v3808_v9 = vadd.f32 %v3807_v36, %v3806_v2  ;;  %v3809_v47 = vpop.f32.mrb[34].mxu0 }
 0x77d   : > { %v3810_v48 = vpop.f32.mrb[35].mxu0 }
 0x77e   : > { %v3811_v37 = vadd.f32 %v3810_v48, %v3809_v47  ;;  %v4179_v4 = vadd.f32 %v3808_v9, %v3725_v15 }
 0x780   : > { %v4189_v20 = vadd.f32 %v3811_v37, %v3725_v15 }
 0x782   : > { %v3812_v40 = vpop.f32.mrb[36].mxu0 }
 0x783   : > { %v3813_v27 = vpop.f32.mrb[37].mxu0 }
 0x784   : > { %v3814_v41 = vadd.f32 %v3813_v27, %v3812_v40  ;;  %v3815_v11 = vpop.f32.mrb[38].mxu0  ;;  %v3726_v40 = vld [vmem:[%s6242_s3] ss:$0 sm:$0xff]  ;;  %s4741_s3 = scalar_lea.vmem %s4740_s19, 2048 }
 0x785   : > { %v3816_v8 = vpop.f32.mrb[39].mxu0  ;;  %p4743_p3 = scmp.lt.s32.totalorder %s4741_s3, %s4735_s27 }
 0x786   : > { %v3817_v26 = vadd.f32 %v3816_v8, %v3815_v11  ;;  %v4174_v6 = vadd.f32 %v3814_v41, %v3725_v15 }
 0x787   : > { %p4744_p2 = por %p4743_p3, %p4742_p1 }
 0x788   : > { %v4184_v63 = vadd.f32 %v3817_v26, %v3725_v15 }
 0x789   : > { %p4745_p8 = pnand %p4744_p2, %p4738_p13 }
 0x78a   : > { %v3846_v43 = vpop.f32.mrb[40].mxu0 }
 0x78b   : > { %v3847_v50 = vpop.f32.mrb[41].mxu0 }
 0x78c   : > { %v3848_v33 = vadd.f32 %v3847_v50, %v3846_v43  ;;  %v3849_v22 = vpop.f32.mrb[42].mxu0 }
 0x78d   : > { %v3850_v19 = vpop.f32.mrb[43].mxu0 }
 0x78e   : > { %v4160_v52 = vadd.f32 %v4159_v31, %v3848_v33  ;;  %v3851_v24 = vadd.f32 %v3850_v19, %v3849_v22 }
 0x790   : > { %v4170_v46 = vadd.f32 %v4169_v7, %v3851_v24 }
 0x792   : > { %v3852_v49 = vpop.f32.mrb[44].mxu0 }
 0x793   : > { %v3853_v54 = vpop.f32.mrb[45].mxu0 }
 0x794   : > { %v3854_v12 = vadd.f32 %v3853_v54, %v3852_v49  ;;  %v3855_v53 = vpop.f32.mrb[46].mxu0 }
 0x795   : > { %v3856_v13 = vpop.f32.mrb[47].mxu0 }
 0x796   : > { %v4155_v55 = vadd.f32 %v4154_v42, %v3854_v12  ;;  %v3857_v17 = vadd.f32 %v3856_v13, %v3855_v53 }
 0x798   : > { %v4165_v57 = vadd.f32 %v4164_v56, %v3857_v17 }
 0x79a   : > { %v3858_v1 = vpop.f32.mrb[48].mxu0 }
 0x79b   : > { %v3859_v25 = vpop.f32.mrb[49].mxu0 }
 0x79c   : > { %v3860_v58 = vadd.f32 %v3859_v25, %v3858_v1  ;;  %v3861_v59 = vpop.f32.mrb[50].mxu0 }
 0x79d   : > { %v3862_v60 = vpop.f32.mrb[51].mxu0 }
 0x79e   : > { %v4180_v62 = vadd.f32 %v4179_v4, %v3860_v58  ;;  %v3863_v28 = vadd.f32 %v3862_v60, %v3861_v59 }
 0x7a0   : > { %v4190_v23 = vadd.f32 %v4189_v20, %v3863_v28 }
 0x7a2   : > { %v3864_v0 = vpop.f32.mrb[52].mxu0 }
 0x7a3   : > { %v3865_v3 = vpop.f32.mrb[53].mxu0 }
 0x7a4   : > { %v3866_v10 = vadd.f32 %v3865_v3, %v3864_v0  ;;  %v3867_v16 = vpop.f32.mrb[54].mxu0 }
 0x7a5   : > { %v3868_v39 = vpop.f32.mrb[55].mxu0 }
 0x7a6   : > { %v4175_v30 = vadd.f32 %v4174_v6, %v3866_v10  ;;  %v3869_v45 = vadd.f32 %v3868_v39, %v3867_v16 }
 0x7a8   : > { %v4185_v18 = vadd.f32 %v4184_v63, %v3869_v45 }
 0x7aa   : > { %v3898_v32 = vpop.f32.mrb[56].mxu0 }
 0x7ab   : > { %v3899_v35 = vpop.f32.mrb[57].mxu0 }
 0x7ac   : > { %v3900_v14 = vadd.f32 %v3899_v35, %v3898_v32  ;;  %v3901_v51 = vpop.f32.mrb[58].mxu0 }
 0x7ad   : > { %v3902_v21 = vpop.f32.mrb[59].mxu0 }
 0x7ae   : > { %v3903_v61 = vadd.f32 %v3902_v21, %v3901_v51  ;;  %v4161_v38 = vadd.f32 %v4160_v52, %v3900_v14 }
 0x7b0   : > { %v4171_v5 = vadd.f32 %v4170_v46, %v3903_v61 }
 0x7b2   : > { %v3904_v29 = vpop.f32.mrb[60].mxu0  ;;  %v4172_v7 = vadd.f32 %v4171_v5, %v3726_v40 }
 0x7b3   : > { %v3905_v44 = vpop.f32.mrb[61].mxu0 }
 0x7b4   : > { %v3906_v34 = vadd.f32 %v3905_v44, %v3904_v29  ;;  %v3907_v2 = vpop.f32.mrb[62].mxu0 }
 0x7b5   : > { %v3908_v36 = vpop.f32.mrb[63].mxu0 }
 0x7b6   : > { %v3909_v9 = vadd.f32 %v3908_v36, %v3907_v2  ;;  %v4156_v47 = vadd.f32 %v4155_v55, %v3906_v34 }
 0x7b8   : > { %v4166_v48 = vadd.f32 %v4165_v57, %v3909_v9 }
 0x7ba   : > { %v3910_v37 = vpop.f32.mrb[64].mxu0  ;;  %v4167_v8 = vadd.f32 %v4166_v48, %v3726_v40 }
 0x7bb   : > { %v3911_v27 = vpop.f32.mrb[65].mxu0 }
 0x7bc   : > { %v3912_v41 = vadd.f32 %v3911_v27, %v3910_v37  ;;  %v3913_v11 = vpop.f32.mrb[66].mxu0 }
 0x7bd   : > { %v4100_v26 = vpop.f32.mrb[36].mxu1  ;;  %v3914_v15 = vpop.f32.mrb[67].mxu0 }
 0x7be   : > { %v4157_v43 = vadd.f32 %v4156_v47, %v4100_v26  ;;  %v4181_v50 = vadd.f32 %v4180_v62, %v3912_v41  ;;  %v3297_v31 = vpop.f32.mrb[37].mxu1  ;;  %v3915_v33 = vadd.f32 %v3914_v15, %v3913_v11 }
 0x7bf   : > { %v4162_v22 = vadd.f32 %v4161_v38, %v3297_v31  ;;  %v4101_v19 = vpop.f32.mrb[38].mxu1 }
 0x7c0   : > { %v4158_v52 = vadd.f32 %v4157_v43, %v3726_v40  ;;  %v4168_v24 = vadd.f32 %v4167_v8, %v4101_v19  ;;  %v4191_v46 = vadd.f32 %v4190_v23, %v3915_v33  ;;  %v3300_v49 = vpop.f32.mrb[39].mxu1  ;;  %v4182_v17 = vadd.f32 %v4181_v50, %v3726_v40 }
 0x7c1   : > { %v4163_v54 = vadd.f32 %v4162_v22, %v3726_v40  ;;  %v4173_v42 = vadd.f32 %v4172_v7, %v3300_v49 }
 0x7c2   : > { %3338 = vst [vmem:[%s6029_s8 + $0x10] sm:$0xff] %v4158_v52  ;;  %3339 = vst [vmem:[%s6029_s8 + $0x18] sm:$0xff] %v4168_v24  ;;  %v3916_v12 = vpop.f32.mrb[68].mxu0  ;;  %v4192_v60 = vadd.f32 %v4191_v46, %v3726_v40 }
 0x7c3   : > { %3336 = vst [vmem:[%s6029_s8] sm:$0xff] %v4163_v54  ;;  %3337 = vst [vmem:[%s6029_s8 + $0x8] sm:$0xff] %v4173_v42  ;;  %v3917_v53 = vpop.f32.mrb[69].mxu0 }
 0x7c4   : > { %v3918_v13 = vadd.f32 %v3917_v53, %v3916_v12  ;;  %v3919_v56 = vpop.f32.mrb[70].mxu0 }
 0x7c5   : > { %v4104_v55 = vpop.f32.mrb[40].mxu1  ;;  %v3920_v57 = vpop.f32.mrb[71].mxu0 }
 0x7c6   : > { %v4176_v1 = vadd.f32 %v4175_v30, %v3918_v13  ;;  %v3313_v25 = vpop.f32.mrb[41].mxu1  ;;  %v3921_v4 = vadd.f32 %v3920_v57, %v3919_v56 }
 0x7c7   : > { %v4183_v58 = vadd.f32 %v4182_v17, %v3313_v25  ;;  %v4105_v59 = vpop.f32.mrb[42].mxu1 }
 0x7c8   : > { %v4177_v20 = vadd.f32 %v4176_v1, %v3726_v40  ;;  %v4186_v62 = vadd.f32 %v4185_v18, %v3921_v4  ;;  %v3316_v28 = vpop.f32.mrb[43].mxu1 }
 0x7c9   : > { %3340 = vst [vmem:[%s6029_s8 + $0x20] sm:$0xff] %v4183_v58  ;;  %v4193_v23 = vadd.f32 %v4192_v60, %v3316_v28 }
 0x7ca   : > { %v4178_v0 = vadd.f32 %v4177_v20, %v4104_v55  ;;  %v4187_v3 = vadd.f32 %v4186_v62, %v3726_v40 }
 0x7cb   : > { %3341 = vst [vmem:[%s6029_s8 + $0x28] sm:$0xff] %v4193_v23 }
 0x7cc   : > { %3342 = vst [vmem:[%s6029_s8 + $0x30] sm:$0xff] %v4178_v0  ;;  %v4188_v6 = vadd.f32 %v4187_v3, %v4105_v59 }
 0x7ce   : > { %3343 = vst [vmem:[%s6029_s8 + $0x38] sm:$0xff] %v4188_v6 }
 0x7cf   : > { %4748 = shalt.err (!%p4745_p8)
}
 0x7d0   : > { %s4749_s8 = scalar_lea.hbm %s6044_s18, 1024  ;;  %s4753_s20 = scalar_lea.hbm %s6243_s0, 2048 }
 0x7d1   : > { %p4750_p4 = scmp.ne.s32.totalorder %s6044_s18, %s4749_s8  ;;  %p4754_p0 = scmp.lt.u32.totalorder %s6044_s18, %s6243_s0 }
 0x7d2   : > { %p4755_p5 = scmp.lt.u32.totalorder %s4753_s20, %s4749_s8  ;;  %p4757_p6 = scmp.lt.u32.totalorder %s4749_s8, %s6044_s18 }
 0x7d3   : > { %p4751_p10 = pnand %p4750_p4, %p6244_p9 }
 0x7d4   : > { %p4756_p7 = por %p4755_p5, %p4754_p0 }
 0x7d5   : > { %p4752_p11 = pneg %p4751_p10 }
 0x7d6   : > { %p4758_p12 = por %p4757_p6, %p4756_p7 }
 0x7d8   : > { %p4759_p13 = pnand %p4758_p12, %p4752_p11 }
 0x7da   : > { %4762 = shalt.err (!%p4759_p13)
}
 0x7db   : > { %s4834_s27 = smov 128   ;;  %s4835_s3 = smov 8  }
 0x7dc   : > { %4244 = dma.vmem_to_hbm [thread:$0]  (%p6244_p9), %s6038_s15, 1024, %s6044_s18, %s3345_s30, %s4834_s27, %s4834_s27, %s4835_s3  }
 0x7dd PF: > { %s3373_s10 = sand.u32 1, %s4801_s21   ;;  %p6245_p1 = scmp.ne.s32.totalorder %s6147_s5, 0 }
 0x7de   : > { %p6246_p3 = scmp.ge.s32.totalorder %s4813_s24, 2  ;;  %s3374_s8 = scalar_lea.sflag [#allocation4], %s3373_s10 }
 0x7e0   : > { %p4270_p2 = pnand %p6246_p3, %p6245_p1 }
 0x7e2   : > { %4796 = dma.done.wait (!%p4270_p2), %s3374_s8, 1024  }
 0x7e3   : > { %4798 = vsyncadd (!%p4270_p2), %s3374_s8, 4294966272  ;;  %p32_p8 = scmp.ge.s32.totalorder %s5107_s29, 4   ;;  %s6247_s21 = smov %s4805_s22 }
 0x7e4   : > { %s6248_s22 = smov %s4809_s23  ;;  %s6249_s23 = smov %s5118_s16 }
 0x7e5   : > { %s6250_s24 = smov %s5107_s29  ;;  %34 = sbr.rel (!%p32_p8) target bundleno = 19 (0x13), region = 157 }
 0x7ec   :  { %3379 = vsyncpa [#allocation3], 1 }
 0x7ed   :  { %3381 = vsyncpa [#allocation3 + $0x1], 1 }
 0x7ee   :  { %3382 = vsyncpa [#allocation6], 1 }
 0x7ef   :  { %3383 = vsyncpa [#allocation9], 1 }
 0x7f0   :  { %3384 = vsyncpa [#allocation12], 1 }
 0x7f1   :  { %3385 = vsyncpa [#allocation4], 1 }
 0x7f2   :  { %3387 = vsyncpa [#allocation4 + $0x1], 1 }

</bundles_post_ra>
